<compile_context>
chip_gen: v7x
topology: tpu7x:2x2x1
jax: 0.10.0
libtpu: 0.0.40
codegen_flags: <defaults>
</compile_context>

<pallas_src>
import functools

import numpy as np

import jax
import jax.numpy as jnp
from jax.experimental import pallas as pl
from jax.experimental.pallas import tpu as pltpu


def _round_up(x, m):
    return -(-x // m) * m


# ----------------------------------------------------------------------------
# Fused Pallas kernel: conv stack + global avg-pool + out-conv in one call
# ----------------------------------------------------------------------------
def _fused_cnn_kernel(*refs, N, H, W, K, kh, pad, L, Hp_pad):
    """Single-invocation fused CNN forward (whole batch in the matmul M dim).

    Ref layout (inputs, then output, then scratch):
      refs[0]                  x_pad  [N*Hp_pad, W*Dpad]  bf16 row-padded input
      refs[1]                  mask   [N*Hp_pad, 1]       f32 (1 interior, 0 pad)
      refs[2+2l], refs[3+2l]   wT_l   [kh, W*Cin_l, W*K]  bf16 row-Toeplitz weights
                               bT_l   [1, W*K]            f32 lane-tiled bias
      refs[2+2(L+1)]           w_pool [W*K, Opad]         bf16 pooled out-conv / (H*W)
      refs[3+2(L+1)]           b_out  [1, Opad]           f32
      refs[4+2(L+1)]           o_ref  [N, Opad]           f32 output
      refs[5+..], refs[6+..]   buf_a / buf_b [N*Hp_pad, W*K] bf16 ping-pong slabs
    """
    R = N * Hp_pad
    WK = W * K

    x_ref, mask_ref = refs[0], refs[1]
    nconv = 2 * (L + 1)
    conv_refs = refs[2:2 + nconv]
    wout_ref = refs[2 + nconv]
    bout_ref = refs[3 + nconv]
    o_ref = refs[4 + nconv]
    buf_a, buf_b = refs[5 + nconv], refs[6 + nconv]

    mask = mask_ref[...]                      # [R, 1] f32, re-zeroes padding rows

    src = x_ref
    pingpong = (buf_a, buf_b)
    for l in range(L + 1):
        wT = conv_refs[2 * l]                 # [kh, W*Cin, W*K] bf16
        bT = conv_refs[2 * l + 1]             # [1, W*K] f32
        dst = pingpong[l % 2]

        # One full-slab matmul per vertical tap (all taps share the same LHS).
        # The vertical offset of tap i is a sublane roll of the f32 partial
        # product; wraparound only touches padding rows (masked below), and
        # padding rows of `src` are zero so rolled contributions are exact.
        s = src[...]                          # [R, W*Cin] bf16, one read per layer
        acc = None
        for i in range(kh):
            t = jnp.dot(s, wT[i], preferred_element_type=jnp.float32)
            sh = (pad - i) % R
            if sh:
                t = pltpu.roll(t, sh, axis=0)
            acc = t if acc is None else acc + t

        # Bias + ReLU in f32, re-zero vertical-padding rows, store slab as bf16.
        dst[...] = (jnp.maximum(acc + bT[...], 0.0) * mask).astype(dst.dtype)
        src = dst

    # AdaptiveAvgPool2d(1) + out-conv tail.  Padding rows are zero, so summing
    # each image's full Hp_pad block equals summing its interior; then a single
    # [N, W*K] @ [W*K, Opad] matmul (1/(H*W) folded into w_pool) + one store.
    act = src[...].astype(jnp.float32).reshape(N, Hp_pad, WK)
    rowsum = jnp.sum(act, axis=1)                                 # [N, W*K]
    out = jnp.dot(rowsum.astype(jnp.bfloat16), wout_ref[...],
                  preferred_element_type=jnp.float32) + bout_ref[...]
    o_ref[...] = out


# ----------------------------------------------------------------------------
# One-time parameter preparation (hoisted out of the forward path)
# ----------------------------------------------------------------------------
def _build_row_toeplitz(w_oihw, W_sp, pad, cin_pad):
    """[Cout,Cin,kh,kw] conv weight -> [kh, W*cin_pad, W*Cout] row-Toeplitz.

    For tap-row i: T_i[(w_in*cin_pad + c), (w*Cout + o)] = W[o, c, i, w_in+pad-w]
    when 0 <= w_in+pad-w < kw, else 0 (encodes horizontal 'same' padding).
    Channels c >= Cin (lane-padding channels) stay zero.
    """
    w_np = np.asarray(jax.device_get(w_oihw), dtype=np.float32)
    cout, cin, kh, kw = w_np.shape
    T = np.zeros((kh, W_sp * cin_pad, W_sp * cout), np.float32)
    for i in range(kh):
        for w in range(W_sp):
            for j in range(kw):
                w_in = w + j - pad
                if 0 <= w_in < W_sp:
                    T[i, w_in * cin_pad:w_in * cin_pad + cin,
                      w * cout:(w + 1) * cout] = w_np[:, :, i, j].T
    return T


def prepare_kernel_params(params, H, W):
    """Convert PyTorch-layout params into the operands the fused kernel eats."""
    convs_in = params["convs"]
    K = int(convs_in[0][0].shape[0])
    kh = int(convs_in[0][0].shape[2])
    pad = int(convs_in[0][2])
    L = len(convs_in) - 1
    D = int(convs_in[0][0].shape[1])

    # Lane-dense packing: pad input channels so W*Dpad is a multiple of 128.
    lane_in = _round_up(W * D, 128)
    assert lane_in % W == 0, "W must divide the padded input lane width"
    Dpad = lane_in // W
    assert (W * K) % 128 == 0, "W*K must be a multiple of 128 for lane-dense slabs"
    # Sublane-aligned per-image row stride (multiple of 8 rows).
    Hp_pad = _round_up(H + 2 * pad, 8)

    convs = []
    for idx, (w, b, p) in enumerate(convs_in):
        cout, cin, kh_, kw_ = w.shape
        # TODO(synk): only stride-1 "same" convs (kh == kw == 2*pad + 1) supported.
        assert kh_ == kw_ and kh_ == 2 * p + 1, "fused kernel assumes stride-1 'same' convs"
        cin_pad = Dpad if idx == 0 else cin
        T = _build_row_toeplitz(w, W, p, cin_pad)                  # [kh, W*cin_pad, W*cout]
        bT = jnp.tile(jnp.asarray(b, jnp.float32), W).reshape(1, W * cout)
        convs.append((jnp.asarray(T, jnp.bfloat16), bT))

    w_o, b_o, pad_o = params["out_conv"]
    o_dim, _, ks_o, _ = w_o.shape
    # On the 1x1 pooled map only the center tap sees a non-zero input, so the
    # out-conv collapses to a dense [K, O] matmul; fold in the 1/(H*W) pooling.
    # TODO(synk): general out-conv geometries (stride != 1, output > 1x1) unsupported.
    assert (1 + 2 * pad_o - ks_o) + 1 == 1 and 0 <= pad_o < ks_o
    Opad = _round_up(o_dim, 128)
    wc = jnp.asarray(w_o, jnp.float32)[:, :, pad_o, pad_o].T       # [K, O] center tap
    w_pool = jnp.tile(wc, (W, 1)) / float(H * W)                   # [W*K, O]
    w_pool = jnp.pad(w_pool, ((0, 0), (0, Opad - o_dim))).astype(jnp.bfloat16)
    b_out = jnp.pad(jnp.asarray(b_o, jnp.float32).reshape(1, o_dim),
                    ((0, 0), (0, Opad - o_dim)))

    return {
        "convs": convs, "w_pool": w_pool, "b_out": b_out,
        "K": K, "O": int(o_dim), "Opad": int(Opad), "kh": kh, "pad": pad,
        "L": L, "D": D, "Dpad": int(Dpad), "Hp_pad": int(Hp_pad),
    }


# ----------------------------------------------------------------------------
# Forward pass (single pallas_call)
# ----------------------------------------------------------------------------
def cnn_forward(x_nchw, kp):
    """Forward pass equivalent to CNN_model.forward. Input NCHW, output [N, O]."""
    N, D, H, W = x_nchw.shape
    K, O, Opad = kp["K"], kp["O"], kp["Opad"]
    kh, pad, L = kp["kh"], kp["pad"], kp["L"]
    Dpad, Hp_pad = kp["Dpad"], kp["Hp_pad"]
    R = N * Hp_pad
    WK = W * K

    # NCHW -> row-padded, lane-dense, channel-minor [N*Hp_pad, W*Dpad] bf16.
    # Vertical padding rows (and extra alignment rows) are zero; horizontal
    # padding is folded into the Toeplitz weights.
    x_nhwc = jnp.transpose(x_nchw, (0, 2, 3, 1))
    x_nhwc = jnp.pad(x_nhwc, ((0, 0), (pad, Hp_pad - H - pad),
                              (0, 0), (0, Dpad - D)))
    x2d = x_nhwc.reshape(R, W * Dpad).astype(jnp.bfloat16)

    # Interior-row mask (1.0 interior, 0.0 vertical padding/alignment rows).
    mask_np = np.zeros((R, 1), np.float32)
    for n in range(N):
        mask_np[n * Hp_pad + pad:n * Hp_pad + pad + H, 0] = 1.0
    mask = jnp.asarray(mask_np)

    args = [x2d, mask]
    for (T, bT) in kp["convs"]:
        args.extend([T, bT])
    args.extend([kp["w_pool"], kp["b_out"]])

    kernel = functools.partial(_fused_cnn_kernel,
                               N=N, H=H, W=W, K=K, kh=kh, pad=pad, L=L,
                               Hp_pad=Hp_pad)
    out = pl.pallas_call(
        kernel,
        out_shape=jax.ShapeDtypeStruct((N, Opad), jnp.float32),
        scratch_shapes=[
            pltpu.VMEM((R, WK), jnp.bfloat16),   # ping activation slab
            pltpu.VMEM((R, WK), jnp.bfloat16),   # pong activation slab
        ],
    )(*args)
    return out[:, :O]


# ----------------------------------------------------------------------------
# Parameter init (PyTorch nn.Conv2d-style) + pure-JAX reference
# ----------------------------------------------------------------------------
def init_params(key, D, O, L, K, ks, padding):
    """Deterministic init mirroring nn.Conv2d's uniform(-1/sqrt(fan_in), ...)."""
    widths = [D] + [K] * (L + 1)
    keys = jax.random.split(key, 2 * (L + 2))
    convs = []
    idx = 0
    for i in range(L + 1):
        cin, cout = widths[i], widths[i + 1]
        bound = 1.0 / (cin * ks * ks) ** 0.5
        w = jax.random.uniform(keys[idx], (cout, cin, ks, ks), jnp.float32,
                               -bound, bound)
        b = jax.random.uniform(keys[idx + 1], (cout,), jnp.float32, -bound, bound)
        idx += 2
        convs.append((w, b, padding))
    bound = 1.0 / (K * ks * ks) ** 0.5
    w_o = jax.random.uniform(keys[idx], (O, K, ks, ks), jnp.float32, -bound, bound)
    b_o = jax.random.uniform(keys[idx + 1], (O,), jnp.float32, -bound, bound)
    return {"convs": convs, "out_conv": (w_o, b_o, padding)}


def _ref_forward(x_nchw, params):
    """Pure-JAX reference (correctness check only)."""
    x = x_nchw
    for (w, b, pad) in params["convs"]:
        x = jax.lax.conv_general_dilated(
            x, w, (1, 1), [(pad, pad), (pad, pad)],
            dimension_numbers=("NCHW", "OIHW", "NCHW"))
        x = jnp.maximum(x + b.reshape(1, -1, 1, 1), 0.0)
    x = jnp.mean(x, axis=(2, 3), keepdims=True)
    w_o, b_o, pad_o = params["out_conv"]
    x = jax.lax.conv_general_dilated(
        x, w_o, (1, 1), [(pad_o, pad_o), (pad_o, pad_o)],
        dimension_numbers=("NCHW", "OIHW", "NCHW"))
    x = x + b_o.reshape(1, -1, 1, 1)
    return x.reshape(x.shape[0], -1)


if __name__ == "__main__":
    # CNN_model(D=4, O=8, L=1, K=16, kernels=3, strides=1, padding=1, phi=ReLU)
    D, O, L, K = 4, 8, 1, 16
    ks, stride, pad = 3, 1, 1          # TODO(synk): general strides not supported

    key = jax.random.PRNGKey(0)
    k_params, k_x = jax.random.split(key)
    params = init_params(k_params, D, O, L, K, ks, pad)
    x = jax.random.normal(k_x, (2, D, 16, 16), jnp.float32)   # NCHW, batch=2

    kparams = prepare_kernel_params(params, H=16, W=16)       # one-time prep
    out = cnn_forward(x, kparams)
    out = jax.block_until_ready(out)

    assert out.shape == (2, O), out.shape
    ref = _ref_forward(x, params)
    # Tolerance sized for bf16 weights/activations on the MXU (f32 accumulate).
    err = float(jnp.max(jnp.abs(out - ref)))
    assert jnp.allclose(out, ref, atol=2e-2, rtol=2e-2), ("max abs diff", err)
    print("KERNEL_OK")
</pallas_src>

<mosaic_0001>
module attributes {stable_mosaic.version = 11 : i64} {
  func.func @_fused_cnn_kernel(%arg0: memref<48x128xbf16, #tpu.memory_space<vmem>>, %arg1: memref<48x1xf32, #tpu.memory_space<vmem>>, %arg2: memref<3x128x256xbf16, #tpu.memory_space<vmem>>, %arg3: memref<1x256xf32, #tpu.memory_space<vmem>>, %arg4: memref<3x256x256xbf16, #tpu.memory_space<vmem>>, %arg5: memref<1x256xf32, #tpu.memory_space<vmem>>, %arg6: memref<256x128xbf16, #tpu.memory_space<vmem>>, %arg7: memref<1x128xf32, #tpu.memory_space<vmem>>, %arg8: memref<2x128xf32, #tpu.memory_space<vmem>>, %arg9: memref<48x256xbf16, #tpu.memory_space<vmem>>, %arg10: memref<48x256xbf16, #tpu.memory_space<vmem>>) attributes {dimension_semantics = [], scalar_prefetch = 0 : i64, scratch_operands = 2 : i64, tpu.core_type = #tpu.core_type<tc>} {
    %c0 = arith.constant 0 : index
    %c0_0 = arith.constant 0 : index
    %0 = vector.load %arg1[%c0, %c0_0] : memref<48x1xf32, #tpu.memory_space<vmem>>, vector<48x1xf32>
    %c0_1 = arith.constant 0 : index
    %c0_2 = arith.constant 0 : index
    %1 = vector.load %arg0[%c0_1, %c0_2] : memref<48x128xbf16, #tpu.memory_space<vmem>>, vector<48x128xbf16>
    %c0_3 = arith.constant 0 : index
    %c0_4 = arith.constant 0 : index
    %c0_5 = arith.constant 0 : index
    %2 = vector.load %arg2[%c0_3, %c0_4, %c0_5] : memref<3x128x256xbf16, #tpu.memory_space<vmem>>, vector<1x128x256xbf16>
    %3 = vector.shape_cast %2 : vector<1x128x256xbf16> to vector<128x256xbf16>
    %cst = arith.constant dense<0.000000e+00> : vector<48x256xf32>
    %4 = tpu.matmul %1, %3, %cst {dimension_numbers = #tpu.dot_dimension_numbers<[1], [0], [0], [1], [0, 0, 1, 1], [], []>} : vector<48x128xbf16>, vector<128x256xbf16>, vector<48x256xf32> -> vector<48x256xf32>
    %c1_i32 = arith.constant 1 : i32
    %5 = tpu.dynamic_rotate %4 by %c1_i32 dim 0 : vector<48x256xf32>, i32 -> vector<48x256xf32>
    %c1 = arith.constant 1 : index
    %c0_6 = arith.constant 0 : index
    %c0_7 = arith.constant 0 : index
    %6 = vector.load %arg2[%c1, %c0_6, %c0_7] : memref<3x128x256xbf16, #tpu.memory_space<vmem>>, vector<1x128x256xbf16>
    %7 = vector.shape_cast %6 : vector<1x128x256xbf16> to vector<128x256xbf16>
    %cst_8 = arith.constant dense<0.000000e+00> : vector<48x256xf32>
    %8 = tpu.matmul %1, %7, %cst_8 {dimension_numbers = #tpu.dot_dimension_numbers<[1], [0], [0], [1], [0, 0, 1, 1], [], []>} : vector<48x128xbf16>, vector<128x256xbf16>, vector<48x256xf32> -> vector<48x256xf32>
    %9 = arith.addf %5, %8 : vector<48x256xf32>
    %c2 = arith.constant 2 : index
    %c0_9 = arith.constant 0 : index
    %c0_10 = arith.constant 0 : index
    %10 = vector.load %arg2[%c2, %c0_9, %c0_10] : memref<3x128x256xbf16, #tpu.memory_space<vmem>>, vector<1x128x256xbf16>
    %11 = vector.shape_cast %10 : vector<1x128x256xbf16> to vector<128x256xbf16>
    %cst_11 = arith.constant dense<0.000000e+00> : vector<48x256xf32>
    %12 = tpu.matmul %1, %11, %cst_11 {dimension_numbers = #tpu.dot_dimension_numbers<[1], [0], [0], [1], [0, 0, 1, 1], [], []>} : vector<48x128xbf16>, vector<128x256xbf16>, vector<48x256xf32> -> vector<48x256xf32>
    %c47_i32 = arith.constant 47 : i32
    %13 = tpu.dynamic_rotate %12 by %c47_i32 dim 0 : vector<48x256xf32>, i32 -> vector<48x256xf32>
    %14 = arith.addf %9, %13 : vector<48x256xf32>
    %c0_12 = arith.constant 0 : index
    %c0_13 = arith.constant 0 : index
    %15 = vector.load %arg3[%c0_12, %c0_13] : memref<1x256xf32, #tpu.memory_space<vmem>>, vector<1x256xf32>
    %16 = vector.broadcast %15 : vector<1x256xf32> to vector<48x256xf32>
    %17 = arith.addf %14, %16 : vector<48x256xf32>
    %cst_14 = arith.constant 0.000000e+00 : f32
    %18 = vector.broadcast %cst_14 : f32 to vector<48x256xf32>
    %19 = arith.maximumf %17, %18 : vector<48x256xf32>
    %20 = vector.broadcast %0 : vector<48x1xf32> to vector<48x256xf32>
    %21 = arith.mulf %19, %20 : vector<48x256xf32>
    %22 = arith.truncf %21 : vector<48x256xf32> to vector<48x256xbf16>
    %c0_15 = arith.constant 0 : index
    %c0_16 = arith.constant 0 : index
    %23 = vector.load %arg9[%c0_15, %c0_16] : memref<48x256xbf16, #tpu.memory_space<vmem>>, vector<48x256xbf16>
    tpu.vector_store %arg9[%c0_15, %c0_16], %22 {strides = array<i32>} : memref<48x256xbf16, #tpu.memory_space<vmem>>, vector<48x256xbf16>,
    %c0_17 = arith.constant 0 : index
    %c0_18 = arith.constant 0 : index
    %24 = vector.load %arg9[%c0_17, %c0_18] : memref<48x256xbf16, #tpu.memory_space<vmem>>, vector<48x256xbf16>
    %c0_19 = arith.constant 0 : index
    %c0_20 = arith.constant 0 : index
    %c0_21 = arith.constant 0 : index
    %25 = vector.load %arg4[%c0_19, %c0_20, %c0_21] : memref<3x256x256xbf16, #tpu.memory_space<vmem>>, vector<1x256x256xbf16>
    %26 = vector.shape_cast %25 : vector<1x256x256xbf16> to vector<256x256xbf16>
    %cst_22 = arith.constant dense<0.000000e+00> : vector<48x256xf32>
    %27 = tpu.matmul %24, %26, %cst_22 {dimension_numbers = #tpu.dot_dimension_numbers<[1], [0], [0], [1], [0, 0, 1, 1], [], []>} : vector<48x256xbf16>, vector<256x256xbf16>, vector<48x256xf32> -> vector<48x256xf32>
    %c1_i32_23 = arith.constant 1 : i32
    %28 = tpu.dynamic_rotate %27 by %c1_i32_23 dim 0 : vector<48x256xf32>, i32 -> vector<48x256xf32>
    %c1_24 = arith.constant 1 : index
    %c0_25 = arith.constant 0 : index
    %c0_26 = arith.constant 0 : index
    %29 = vector.load %arg4[%c1_24, %c0_25, %c0_26] : memref<3x256x256xbf16, #tpu.memory_space<vmem>>, vector<1x256x256xbf16>
    %30 = vector.shape_cast %29 : vector<1x256x256xbf16> to vector<256x256xbf16>
    %cst_27 = arith.constant dense<0.000000e+00> : vector<48x256xf32>
    %31 = tpu.matmul %24, %30, %cst_27 {dimension_numbers = #tpu.dot_dimension_numbers<[1], [0], [0], [1], [0, 0, 1, 1], [], []>} : vector<48x256xbf16>, vector<256x256xbf16>, vector<48x256xf32> -> vector<48x256xf32>
    %32 = arith.addf %28, %31 : vector<48x256xf32>
    %c2_28 = arith.constant 2 : index
    %c0_29 = arith.constant 0 : index
    %c0_30 = arith.constant 0 : index
    %33 = vector.load %arg4[%c2_28, %c0_29, %c0_30] : memref<3x256x256xbf16, #tpu.memory_space<vmem>>, vector<1x256x256xbf16>
    %34 = vector.shape_cast %33 : vector<1x256x256xbf16> to vector<256x256xbf16>
    %cst_31 = arith.constant dense<0.000000e+00> : vector<48x256xf32>
    %35 = tpu.matmul %24, %34, %cst_31 {dimension_numbers = #tpu.dot_dimension_numbers<[1], [0], [0], [1], [0, 0, 1, 1], [], []>} : vector<48x256xbf16>, vector<256x256xbf16>, vector<48x256xf32> -> vector<48x256xf32>
    %c47_i32_32 = arith.constant 47 : i32
    %36 = tpu.dynamic_rotate %35 by %c47_i32_32 dim 0 : vector<48x256xf32>, i32 -> vector<48x256xf32>
    %37 = arith.addf %32, %36 : vector<48x256xf32>
    %c0_33 = arith.constant 0 : index
    %c0_34 = arith.constant 0 : index
    %38 = vector.load %arg5[%c0_33, %c0_34] : memref<1x256xf32, #tpu.memory_space<vmem>>, vector<1x256xf32>
    %39 = vector.broadcast %38 : vector<1x256xf32> to vector<48x256xf32>
    %40 = arith.addf %37, %39 : vector<48x256xf32>
    %cst_35 = arith.constant 0.000000e+00 : f32
    %41 = vector.broadcast %cst_35 : f32 to vector<48x256xf32>
    %42 = arith.maximumf %40, %41 : vector<48x256xf32>
    %43 = vector.broadcast %0 : vector<48x1xf32> to vector<48x256xf32>
    %44 = arith.mulf %42, %43 : vector<48x256xf32>
    %45 = arith.truncf %44 : vector<48x256xf32> to vector<48x256xbf16>
    %c0_36 = arith.constant 0 : index
    %c0_37 = arith.constant 0 : index
    %46 = vector.load %arg10[%c0_36, %c0_37] : memref<48x256xbf16, #tpu.memory_space<vmem>>, vector<48x256xbf16>
    tpu.vector_store %arg10[%c0_36, %c0_37], %45 {strides = array<i32>} : memref<48x256xbf16, #tpu.memory_space<vmem>>, vector<48x256xbf16>,
    %c0_38 = arith.constant 0 : index
    %c0_39 = arith.constant 0 : index
    %47 = vector.load %arg10[%c0_38, %c0_39] : memref<48x256xbf16, #tpu.memory_space<vmem>>, vector<48x256xbf16>
    %48 = arith.extf %47 : vector<48x256xbf16> to vector<48x256xf32>
    %49 = vector.shape_cast %48 : vector<48x256xf32> to vector<2x24x256xf32>
    %cst_40 = arith.constant dense<0.000000e+00> : vector<2x256xf32>
    %50 = vector.multi_reduction <add>, %49, %cst_40 [1] : vector<2x24x256xf32> to vector<2x256xf32>
    %51 = arith.truncf %50 : vector<2x256xf32> to vector<2x256xbf16>
    %c0_41 = arith.constant 0 : index
    %c0_42 = arith.constant 0 : index
    %52 = vector.load %arg6[%c0_41, %c0_42] : memref<256x128xbf16, #tpu.memory_space<vmem>>, vector<256x128xbf16>
    %cst_43 = arith.constant dense<0.000000e+00> : vector<2x128xf32>
    %53 = tpu.matmul %51, %52, %cst_43 {dimension_numbers = #tpu.dot_dimension_numbers<[1], [0], [0], [1], [0, 0, 1, 1], [], []>} : vector<2x256xbf16>, vector<256x128xbf16>, vector<2x128xf32> -> vector<2x128xf32>
    %c0_44 = arith.constant 0 : index
    %c0_45 = arith.constant 0 : index
    %54 = vector.load %arg7[%c0_44, %c0_45] : memref<1x128xf32, #tpu.memory_space<vmem>>, vector<1x128xf32>
    %55 = vector.broadcast %54 : vector<1x128xf32> to vector<2x128xf32>
    %56 = arith.addf %53, %55 : vector<2x128xf32>
    %c0_46 = arith.constant 0 : index
    %c0_47 = arith.constant 0 : index
    %57 = vector.load %arg8[%c0_46, %c0_47] : memref<2x128xf32, #tpu.memory_space<vmem>>, vector<2x128xf32>
    tpu.vector_store %arg8[%c0_46, %c0_47], %56 {strides = array<i32>} : memref<2x128xf32, #tpu.memory_space<vmem>>, vector<2x128xf32>,
    return
  }
}

</mosaic_0001>

<bundles_post_ra>
// kernel: tpu_custom_call.1
= control target key start
LH: loop header
LB: loop body
LE: loop exit
PB: predicated region body
PF: predicated region fallthrough
CT: control target
= control target key end

     0   :  { %13 = vsyncpa [#allocation5], 0  ;;  %s2888_s0 = inlined_call_operand.vmem [shape: bf16[48,128], index: 0, kind: input, shape index: {}]   ;;  %s2889_s1 = inlined_call_operand.vmem [shape: f32[48,1], index: 1, kind: input, shape index: {}]   ;;  %s2890_s2 = inlined_call_operand.hbm [shape: bf16[3,128,256], index: 2, kind: input, shape index: {}]   ;;  %s2891_s3 = inlined_call_operand.vmem [shape: f32[1,256], index: 3, kind: input, shape index: {}]   ;;  %s2892_s4 = inlined_call_operand.hbm [shape: bf16[3,256,256], index: 4, kind: input, shape index: {}]   ;;  %s2893_s5 = inlined_call_operand.vmem [shape: f32[1,256], index: 5, kind: input, shape index: {}]   ;;  %s2894_s6 = inlined_call_operand.hbm [shape: bf16[256,128], index: 6, kind: input, shape index: {}]   ;;  %s2895_s7 = inlined_call_operand.vmem [shape: f32[1,128], index: 7, kind: input, shape index: {}]   ;;  %s2896_s8 = inlined_call_operand.hbm [shape: f32[2,128], index: 8, kind: output, shape index: {}]  }
   0x1   :  { %14 = vsyncpa [#allocation8], 0 }
   0x2   :  { %15 = vsyncpa [#allocation6], 0  ;;  %s2439_s27 = smov [#allocation7]   ;;  %s2440_s29 = smov [#allocation4]  }
   0x3   :  { %s39_s28 = sshll.u32 %s2439_s27, 4  ;;  %s25_s30 = sshll.u32 %s2440_s29, 4  ;;  %s40_s28 = int_to_ptr.vmem [resolvable:$true] %s39_s28  ;;  %s2493_s30 = int_to_ptr.vmem [resolvable:$true] %s25_s30 }
   0x4   :  { %s2345_s11 = scalar_lea.hbm %s2892_s4, 12288 }
   0x5   :  { %p2346_p0 = scmp.ne.s32.totalorder %s2892_s4, %s2345_s11  ;;  %p2349_p1 = scmp.lt.u32.totalorder %s2345_s11, %s2892_s4 }
   0x7   :  { %p2351_p2 = pnand %p2349_p1, %p2346_p0 }
   0x9   :  { %2354 = shalt.err (!%p2351_p2)
}
   0xa   :  { %s2355_s16 = scalar_lea.vmem %s40_s28, 12288  ;;  %p2360_p4 = scmp.lt.s32.totalorder %s40_s28, %s40_s28 }
   0xb   :  { %p2356_p3 = scmp.ne.s32.totalorder %s40_s28, %s2355_s16  ;;  %p2361_p5 = scmp.lt.s32.totalorder %s2355_s16, %s2355_s16 }
   0xd   :  { %p2362_p6 = por %p2361_p5, %p2360_p4 }
   0xf   :  { %p2363_p7 = pnand %p2362_p6, %p2356_p3 }
  0x11   :  { %2366 = shalt.err (!%p2363_p7)
}
  0x12   :  { %s2441_s17 = smov 128   ;;  %s2442_s18 = smov 8  }
  0x13   :  { %45 = dma.hbm_to_vmem [thread:$0]  %s2892_s4, 12288, %s40_s28, [#allocation8], %s2441_s17, %s2441_s17, %s2442_s18  }
  0x14   :  { %s2367_s23 = scalar_lea.hbm %s2890_s2, 6144 }
  0x15   :  { %p2368_p8 = scmp.ne.s32.totalorder %s2890_s2, %s2367_s23  ;;  %p2371_p9 = scmp.lt.u32.totalorder %s2367_s23, %s2890_s2 }
  0x17   :  { %p2373_p10 = pnand %p2371_p9, %p2368_p8 }
  0x19   :  { %2376 = shalt.err (!%p2373_p10)
}
  0x1a   :  { %s2377_s29 = scalar_lea.vmem %s2493_s30, 6144  ;;  %p2382_p12 = scmp.lt.s32.totalorder %s2493_s30, %s2493_s30 }
  0x1b   :  { %p2378_p11 = scmp.ne.s32.totalorder %s2493_s30, %s2377_s29  ;;  %p2383_p13 = scmp.lt.s32.totalorder %s2377_s29, %s2377_s29 }
  0x1d   :  { %p2384_p0 = por %p2383_p13, %p2382_p12 }
  0x1f   :  { %p2385_p1 = pnand %p2384_p0, %p2378_p11 }
  0x21   :  { %2388 = shalt.err (!%p2385_p1)
}
  0x22   :  { %31 = dma.hbm_to_vmem [thread:$0]  %s2890_s2, 6144, %s2493_s30, [#allocation5], %s2441_s17, %s2441_s17, %s2442_s18  }
  0x23   :  { %s2443_s9 = smov [#allocation9]   ;;  %s2389_s13 = scalar_lea.hbm %s2894_s6, 2048 }
  0x24   :  { %s53_s10 = sshll.u32 %s2443_s9, 4  ;;  %p2390_p2 = scmp.ne.s32.totalorder %s2894_s6, %s2389_s13  ;;  %s54_s10 = int_to_ptr.vmem [resolvable:$true] %s53_s10 }
  0x25   :  { %p2393_p3 = scmp.lt.u32.totalorder %s2389_s13, %s2894_s6 }
  0x27   :  { %p2395_p4 = pnand %p2393_p3, %p2390_p2 }
  0x29   :  { %2398 = shalt.err (!%p2395_p4)
}
  0x2a   :  { %s2399_s20 = scalar_lea.vmem %s54_s10, 2048  ;;  %p2404_p6 = scmp.lt.s32.totalorder %s54_s10, %s54_s10 }
  0x2b   :  { %p2400_p5 = scmp.ne.s32.totalorder %s54_s10, %s2399_s20  ;;  %p2405_p7 = scmp.lt.s32.totalorder %s2399_s20, %s2399_s20 }
  0x2d   :  { %p2406_p8 = por %p2405_p7, %p2404_p6 }
  0x2f   :  { %p2407_p9 = pnand %p2406_p8, %p2400_p5 }
  0x31   :  { %2410 = shalt.err (!%p2407_p9)
}
  0x32   :  { %s2444_s2 = smov 64   ;;  %s2445_s30 = smov 4  }
  0x33   :  { %59 = dma.hbm_to_vmem [thread:$0]  %s2894_s6, 2048, %s54_s10, [#allocation8], %s2444_s2, %s2444_s2, %s2445_s30  }
  0x34   :  { %2433 = dma.done.wait [#allocation5], 6144  }
  0x35   :  { %2434 = vsyncadd [#allocation5], 4294961152 }
  0x36   :  { %2435 = dma.done.wait [#allocation8], 14336  }
  0x37   :  { %2436 = vsyncadd [#allocation8], 4294952960  ;;  %v2446_v0 = vmov 0   ;;  %v2110_v1 = vld [vmem:[#allocation4 + $0x4] ss:$8 sps:$4 sm:$0xff]   ;;  %v74_v42 = vld [vmem:[%s2889_s1 + $0x10] sm:$0xff] }
  0x38   :  { %230 = vmatprep.mubr.bf16.mxu0 %v2446_v0  ;;  %417 = vmatprep.mubr.bf16.mxu1 %v2446_v0  ;;  %v2112_v2 = vld [vmem:[#allocation4] ss:$8 sps:$4 sm:$0xff]   ;;  %v2113_v3 = vld [vmem:[#allocation4 + $0x84] ss:$8 sps:$4 sm:$0xff]   ;;  %v2115_v4 = vld [vmem:[#allocation4 + $0x14] ss:$8 sps:$4 sm:$0xff]  }
  0x39   :  { %2108 = vset.pattern.permute.xlu0 %v2446_v0  ;;  %2109 = vset.pattern.permute.xlu1 %v2446_v0  ;;  %v2117_v5 = vld [vmem:[#allocation4 + $0x80] ss:$8 sps:$4 sm:$0xff]   ;;  %v2118_v6 = vld [vmem:[#allocation4 + $0x10] ss:$8 sps:$4 sm:$0xff]   ;;  %v2119_v7 = vld [vmem:[#allocation4 + $0x94] ss:$8 sps:$4 sm:$0xff]  }
  0x3a   :  { %198 = vmatprep.subr.bf16.mxu0 %v2110_v1  ;;  %385 = vmatprep.subr.bf16.mxu1 %v2113_v3  ;;  %v2121_v8 = vld [vmem:[#allocation4 + $0x24] ss:$8 sps:$4 sm:$0xff]   ;;  %v2123_v9 = vld [vmem:[#allocation4 + $0x90] ss:$8 sps:$4 sm:$0xff]   ;;  %v2124_v10 = vld [vmem:[#allocation4 + $0x20] ss:$8 sps:$4 sm:$0xff]  }
  0x3b   :  { %199 = vmatpush1.bf16.msra.mxu0 %v2112_v2  ;;  %386 = vmatpush1.bf16.msra.mxu1 %v2117_v5  ;;  %v2125_v11 = vld [vmem:[#allocation4 + $0xa4] ss:$8 sps:$4 sm:$0xff]   ;;  %v2127_v12 = vld [vmem:[#allocation4 + $0x34] ss:$8 sps:$4 sm:$0xff]   ;;  %v2129_v13 = vld [vmem:[#allocation4 + $0xa0] ss:$8 sps:$4 sm:$0xff]  }
  0x3c   :  { %200 = vmatprep.subr.bf16.mxu0 %v2115_v4  ;;  %387 = vmatprep.subr.bf16.mxu1 %v2119_v7  ;;  %v2131_v14 = vld [vmem:[#allocation4 + $0xb4] ss:$8 sps:$4 sm:$0xff]   ;;  %v2130_v15 = vld [vmem:[#allocation4 + $0x30] ss:$8 sps:$4 sm:$0xff]   ;;  %v2133_v16 = vld [vmem:[#allocation4 + $0x44] ss:$8 sps:$4 sm:$0xff]  }
  0x3d   :  { %v2135_v17 = vld [vmem:[#allocation4 + $0xb0] ss:$8 sps:$4 sm:$0xff]   ;;  %v2137_v18 = vld [vmem:[#allocation4 + $0xc4] ss:$8 sps:$4 sm:$0xff]   ;;  %v2136_v19 = vld [vmem:[#allocation4 + $0x40] ss:$8 sps:$4 sm:$0xff]   ;;  %705 = vperm.xlu1 %2109, %v74_v42  }
  0x3e   :  { %v2139_v20 = vld [vmem:[#allocation4 + $0x54] ss:$8 sps:$4 sm:$0xff]   ;;  %v2141_v21 = vld [vmem:[#allocation4 + $0xc0] ss:$8 sps:$4 sm:$0xff]   ;;  %v2142_v23 = vld [vmem:[#allocation4 + $0x50] ss:$8 sps:$4 sm:$0xff]  }
  0x3f   :  { %201 = vmatpush1.bf16.msra.mxu0 %v2118_v6  ;;  %388 = vmatpush1.bf16.msra.mxu1 %v2123_v9  ;;  %v2143_v22 = vld [vmem:[#allocation4 + $0xd4] ss:$8 sps:$4 sm:$0xff]   ;;  %v2145_v24 = vld [vmem:[#allocation4 + $0x64] ss:$8 sps:$4 sm:$0xff]   ;;  %v2147_v25 = vld [vmem:[#allocation4 + $0xd0] ss:$8 sps:$4 sm:$0xff]  }
  0x40   :  { %202 = vmatprep.subr.bf16.mxu0 %v2121_v8  ;;  %389 = vmatprep.subr.bf16.mxu1 %v2125_v11  ;;  %v2149_v26 = vld [vmem:[#allocation4 + $0xe4] ss:$8 sps:$4 sm:$0xff]   ;;  %v2148_v27 = vld [vmem:[#allocation4 + $0x60] ss:$8 sps:$4 sm:$0xff]   ;;  %v2151_v28 = vld [vmem:[#allocation4 + $0x74] ss:$8 sps:$4 sm:$0xff]  }
  0x41   :  { %v2153_v29 = vld [vmem:[#allocation4 + $0xe0] ss:$8 sps:$4 sm:$0xff]   ;;  %v2155_v30 = vld [vmem:[#allocation4 + $0xf4] ss:$8 sps:$4 sm:$0xff]   ;;  %v2154_v31 = vld [vmem:[#allocation4 + $0x70] ss:$8 sps:$4 sm:$0xff]  }
  0x42   :  { %v2161_v32 = vld [vmem:[#allocation4 + $0x104] ss:$8 sps:$4 sm:$0xff]   ;;  %v2158_v33 = vld [vmem:[#allocation4 + $0xf0] ss:$8 sps:$4 sm:$0xff]   ;;  %v2159_v35 = vld [vmem:[#allocation4 + $0x100] ss:$8 sps:$4 sm:$0xff]  }
  0x43   :  { %203 = vmatpush1.bf16.msra.mxu0 %v2124_v10  ;;  %390 = vmatpush1.bf16.msra.mxu1 %v2129_v13  ;;  %v2543_v34 = vld [vmem:[%s2888_s0] sm:$0xff]   ;;  %v2164_v36 = vld [vmem:[#allocation4 + $0x114] ss:$8 sps:$4 sm:$0xff]   ;;  %v2162_v37 = vld [vmem:[#allocation4 + $0x110] ss:$8 sps:$4 sm:$0xff]   ;;  %vm1753_vm2 = vcmask 1041409  }
  0x44   :  { %204 = vmatprep.subr.bf16.mxu0 %v2127_v12  ;;  %391 = vmatprep.subr.bf16.mxu1 %v2131_v14  ;;  %v72_v38 = vld [vmem:[%s2889_s1] sm:$0xff]  ;;  %v2554_v39 = vld [vmem:[%s2888_s0 + $0x8] sm:$0xff]   ;;  %v75_v46 = vld [vmem:[%s2889_s1 + $0x18] sm:$0xff]  ;;  %s2447_s20 = smov [#allocation10]  }
  0x45   :  { %v2168_v40 = vld [vmem:[#allocation4 + $0x124] ss:$8 sps:$4 sm:$0xff]   ;;  %695 = vperm.xlu0 %2108, %v72_v38   ;;  %v2185_v43 = vld [vmem:[#allocation7] ss:$8 sps:$4 sm:$0xff]   ;;  %v2171_v47 = vld [vmem:[#allocation4 + $0x134] ss:$8 sps:$4 sm:$0xff]   ;;  %710 = vperm.xlu1 %2109, %v75_v46  }
  0x46   :  { %v73_v41 = vld [vmem:[%s2889_s1 + $0x8] sm:$0xff]  ;;  %v76_v48 = vld [vmem:[%s2889_s1 + $0x20] sm:$0xff]  ;;  %v2169_v49 = vld [vmem:[#allocation4 + $0x130] ss:$8 sps:$4 sm:$0xff]   ;;  %s1903_s2 = sshll.u32 %s2447_s20, 4  ;;  %s1904_s2 = int_to_ptr.vmem [resolvable:$true] %s1903_s2 }
  0x47   :  { %205 = vmatpush1.bf16.msra.mxu0 %v2130_v15  ;;  %392 = vmatpush1.bf16.msra.mxu1 %v2135_v17  ;;  %v2187_v44 = vld [vmem:[#allocation7 + $0x4] ss:$8 sps:$4 sm:$0xff]   ;;  %v2166_v45 = vld [vmem:[#allocation4 + $0x120] ss:$8 sps:$4 sm:$0xff]   ;;  %v2193_v52 = vld [vmem:[#allocation7 + $0x14] ss:$8 sps:$4 sm:$0xff]   ;;  %p2416_p11 = scmp.lt.s32.totalorder %s1904_s2, %s1904_s2 }
  0x48   :  { %206 = vmatprep.subr.bf16.mxu0 %v2133_v16  ;;  %393 = vmatprep.subr.bf16.mxu1 %v2137_v18  ;;  %v77_v50 = vld [vmem:[%s2889_s1 + $0x28] sm:$0xff]  ;;  %v2191_v53 = vld [vmem:[#allocation7 + $0x10] ss:$8 sps:$4 sm:$0xff]   ;;  %v2178_v57 = vld [vmem:[#allocation4 + $0x154] ss:$8 sps:$4 sm:$0xff]   ;;  %s2411_s30 = scalar_lea.vmem %s1904_s2, 32 }
  0x49   :  { %700 = vperm.xlu0 %2108, %v73_v41   ;;  %v2175_v51 = vld [vmem:[#allocation4 + $0x144] ss:$8 sps:$4 sm:$0xff]   ;;  %v2172_v55 = vld [vmem:[%s2888_s0 + $0x10] sm:$0xff]   ;;  %v2173_v56 = vld [vmem:[#allocation4 + $0x140] ss:$8 sps:$4 sm:$0xff]   ;;  %720 = vperm.xlu1 %2109, %v77_v50   ;;  %p2412_p10 = scmp.ne.s32.totalorder %s1904_s2, %s2411_s30  ;;  %p2417_p12 = scmp.lt.s32.totalorder %s2411_s30, %s2411_s30 }
  0x4a   :  { %v2199_v54 = vld [vmem:[#allocation7 + $0x24] ss:$8 sps:$4 sm:$0xff]   ;;  %v2197_v58 = vld [vmem:[#allocation7 + $0x20] ss:$8 sps:$4 sm:$0xff]   ;;  %v2176_v59 = vld [vmem:[#allocation4 + $0x150] ss:$8 sps:$4 sm:$0xff]  }
  0x4b   :  { %207 = vmatpush1.bf16.msra.mxu0 %v2136_v19  ;;  %394 = vmatpush1.bf16.msra.mxu1 %v2141_v21  ;;  %v2181_v60 = vld [vmem:[#allocation4 + $0x164] ss:$8 sps:$4 sm:$0xff]   ;;  %v2179_v61 = vld [vmem:[#allocation4 + $0x160] ss:$8 sps:$4 sm:$0xff]   ;;  %v2184_v62 = vld [vmem:[#allocation4 + $0x174] ss:$8 sps:$4 sm:$0xff]   ;;  %p2418_p13 = por %p2417_p12, %p2416_p11 }
  0x4c   :  { %208 = vmatprep.subr.bf16.mxu0 %v2139_v20  ;;  %395 = vmatprep.subr.bf16.mxu1 %v2143_v22  ;;  %v2182_v63 = vld [vmem:[#allocation4 + $0x170] ss:$8 sps:$4 sm:$0xff]   ;;  %v2190_v1 = vld [vmem:[#allocation7 + $0x104] ss:$8 sps:$4 sm:$0xff]   ;;  %v2188_v2 = vld [vmem:[#allocation7 + $0x100] ss:$8 sps:$4 sm:$0xff]  }
  0x4d   :  { %715 = vperm.xlu0 %2108, %v76_v48   ;;  %v2196_v3 = vld [vmem:[#allocation7 + $0x114] ss:$8 sps:$4 sm:$0xff]   ;;  %v2194_v4 = vld [vmem:[#allocation7 + $0x110] ss:$8 sps:$4 sm:$0xff]   ;;  %v2202_v5 = vld [vmem:[#allocation7 + $0x124] ss:$8 sps:$4 sm:$0xff]   ;;  %p2419_p0 = pnand %p2418_p13, %p2412_p10 }
  0x4e   :  { %v2200_v6 = vld [vmem:[#allocation7 + $0x120] ss:$8 sps:$4 sm:$0xff]   ;;  %v2205_v7 = vld [vmem:[#allocation7 + $0x34] ss:$8 sps:$4 sm:$0xff]   ;;  %v2203_v8 = vld [vmem:[#allocation7 + $0x30] ss:$8 sps:$4 sm:$0xff]  }
  0x4f   :  { %209 = vmatpush1.bf16.msra.mxu0 %v2142_v23  ;;  %396 = vmatpush1.bf16.msra.mxu1 %v2147_v25  ;;  %v2208_v9 = vld [vmem:[#allocation7 + $0x134] ss:$8 sps:$4 sm:$0xff]   ;;  %v2206_v10 = vld [vmem:[#allocation7 + $0x130] ss:$8 sps:$4 sm:$0xff]   ;;  %v2211_v11 = vld [vmem:[#allocation7 + $0x44] ss:$8 sps:$4 sm:$0xff]  }
  0x50   :  { %210 = vmatprep.subr.bf16.mxu0 %v2145_v24  ;;  %397 = vmatprep.subr.bf16.mxu1 %v2149_v26  ;;  %v2209_v12 = vld [vmem:[#allocation7 + $0x40] ss:$8 sps:$4 sm:$0xff]   ;;  %v2214_v13 = vld [vmem:[#allocation7 + $0x144] ss:$8 sps:$4 sm:$0xff]   ;;  %v2215_v15 = vld [vmem:[#allocation7 + $0x50] ss:$8 sps:$4 sm:$0xff]  }
  0x51   :  { %v2212_v14 = vld [vmem:[#allocation7 + $0x140] ss:$8 sps:$4 sm:$0xff]   ;;  %v2220_v16 = vld [vmem:[#allocation7 + $0x154] ss:$8 sps:$4 sm:$0xff]   ;;  %v2218_v17 = vld [vmem:[#allocation7 + $0x150] ss:$8 sps:$4 sm:$0xff]  }
  0x52   :  { %v2221_v18 = vld [vmem:[#allocation7 + $0x60] ss:$8 sps:$4 sm:$0xff]   ;;  %v2223_v19 = vld [vmem:[#allocation7 + $0x64] ss:$8 sps:$4 sm:$0xff]   ;;  %v2229_v22 = vld [vmem:[#allocation7 + $0x74] ss:$8 sps:$4 sm:$0xff]  }
  0x53   :  { %211 = vmatpush1.bf16.msra.mxu0 %v2148_v27  ;;  %398 = vmatpush1.bf16.msra.mxu1 %v2153_v29  ;;  %v2226_v20 = vld [vmem:[#allocation7 + $0x164] ss:$8 sps:$4 sm:$0xff]   ;;  %v2224_v21 = vld [vmem:[#allocation7 + $0x160] ss:$8 sps:$4 sm:$0xff]   ;;  %v2227_v23 = vld [vmem:[#allocation7 + $0x70] ss:$8 sps:$4 sm:$0xff]  }
  0x54   :  { %212 = vmatprep.subr.bf16.mxu0 %v2151_v28  ;;  %399 = vmatprep.subr.bf16.mxu1 %v2155_v30  ;;  %v2232_v24 = vld [vmem:[#allocation7 + $0x174] ss:$8 sps:$4 sm:$0xff]   ;;  %v2230_v25 = vld [vmem:[#allocation7 + $0x170] ss:$8 sps:$4 sm:$0xff]   ;;  %v2235_v26 = vld [vmem:[#allocation7 + $0x84] ss:$8 sps:$4 sm:$0xff]  }
  0x55   :  { %v2233_v27 = vld [vmem:[#allocation7 + $0x80] ss:$8 sps:$4 sm:$0xff]   ;;  %v2238_v28 = vld [vmem:[#allocation7 + $0x184] ss:$8 sps:$4 sm:$0xff]   ;;  %v2241_v30 = vld [vmem:[#allocation7 + $0x94] ss:$8 sps:$4 sm:$0xff]  }
  0x56   :  { %v2236_v29 = vld [vmem:[#allocation7 + $0x180] ss:$8 sps:$4 sm:$0xff]   ;;  %v2253_v38 = vld [vmem:[#allocation7 + $0xb4] ss:$8 sps:$4 sm:$0xff]   ;;  %v2254_v41 = vld [vmem:[#allocation7 + $0x1b0] ss:$8 sps:$4 sm:$0xff]  }
  0x57   :  { %213 = vmatpush1.bf16.msra.mxu0 %v2154_v31  ;;  %400 = vmatpush1.bf16.msra.mxu1 %v2158_v33  ;;  %v2239_v31 = vld [vmem:[#allocation7 + $0x90] ss:$8 sps:$4 sm:$0xff]   ;;  %v2259_v42 = vld [vmem:[#allocation7 + $0xc4] ss:$8 sps:$4 sm:$0xff]   ;;  %v2265_v46 = vld [vmem:[#allocation7 + $0xd4] ss:$8 sps:$4 sm:$0xff]  }
  0x58   :  { %557 = vmatprep.subr.bf16.mxu0 %v2161_v32  ;;  %945 = vmatprep.subr.bf16.mxu1 %v2187_v44  ;;  %v2244_v32 = vld [vmem:[#allocation7 + $0x194] ss:$8 sps:$4 sm:$0xff]   ;;  %v2242_v33 = vld [vmem:[#allocation7 + $0x190] ss:$8 sps:$4 sm:$0xff]   ;;  %v2262_v44 = vld [vmem:[#allocation7 + $0x1c4] ss:$8 sps:$4 sm:$0xff]  }
  0x59   :  { %v2268_v48 = vld [vmem:[#allocation7 + $0x1d4] ss:$8 sps:$4 sm:$0xff]   ;;  %v2271_v50 = vld [vmem:[#allocation7 + $0xe4] ss:$8 sps:$4 sm:$0xff]  }
  0x5a   :  { %231 = vmatmul.mubr.bf16.vlgmr.msra.gmra.mrb[0].mxu0 %v2543_v34  ;;  %418 = vmatmul.mubr.bf16.vlgmr.msra.gmra.mrb[0].mxu1 %v2543_v34 }
  0x5b   :  { %558 = vmatpush1.bf16.msra.mxu0 %v2159_v35  ;;  %240 = vmatprep.mubr.bf16.mxu0 %v2446_v0  ;;  %v2245_v35 = vld [vmem:[#allocation7 + $0xa0] ss:$8 sps:$4 sm:$0xff]  }
  0x5c   :  { %559 = vmatprep.subr.bf16.mxu0 %v2164_v36  ;;  %427 = vmatprep.mubr.bf16.mxu1 %v2446_v0  ;;  %v2250_v36 = vld [vmem:[#allocation7 + $0x1a4] ss:$8 sps:$4 sm:$0xff]  }
  0x5d   :  { %946 = vmatpush1.bf16.msra.mxu1 %v2185_v43  ;;  %v2257_v43 = vld [vmem:[#allocation7 + $0xc0] ss:$8 sps:$4 sm:$0xff]  }
  0x5e   :  { %947 = vmatprep.subr.bf16.mxu1 %v2193_v52  ;;  %v2274_v52 = vld [vmem:[#allocation7 + $0x1e4] ss:$8 sps:$4 sm:$0xff]  }
  0x5f   :  { %560 = vmatpush1.bf16.msra.mxu0 %v2162_v37  ;;  %v2248_v37 = vld [vmem:[#allocation7 + $0x1a0] ss:$8 sps:$4 sm:$0xff]  }
  0x60   :  { %561 = vmatprep.subr.bf16.mxu0 %v2168_v40  ;;  %v2256_v40 = vld [vmem:[#allocation7 + $0x1b4] ss:$8 sps:$4 sm:$0xff]  }
  0x61   :  { %948 = vmatpush1.bf16.msra.mxu1 %v2191_v53  ;;  %v2272_v53 = vld [vmem:[#allocation7 + $0x1e0] ss:$8 sps:$4 sm:$0xff]  }
  0x62   :  { %241 = vmatmul.mubr.bf16.gmra.mrb[4].mxu0 %v2554_v39  ;;  %428 = vmatmul.mubr.bf16.gmra.mrb[4].mxu1 %v2554_v39 }
  0x63   :  { %562 = vmatpush1.bf16.msra.mxu0 %v2166_v45  ;;  %250 = vmatprep.mubr.bf16.mxu0 %v2446_v0  ;;  %v2260_v45 = vld [vmem:[#allocation7 + $0x1c0] ss:$8 sps:$4 sm:$0xff]  }
  0x64   :  { %563 = vmatprep.subr.bf16.mxu0 %v2171_v47  ;;  %437 = vmatprep.mubr.bf16.mxu1 %v2446_v0  ;;  %v2263_v47 = vld [vmem:[#allocation7 + $0xd0] ss:$8 sps:$4 sm:$0xff]  }
  0x65   :  { %949 = vmatprep.subr.bf16.mxu1 %v2199_v54  ;;  %v2277_v54 = vld [vmem:[#allocation7 + $0xf4] ss:$8 sps:$4 sm:$0xff]  }
  0x66   :  { %950 = vmatpush1.bf16.msra.mxu1 %v2197_v58  ;;  %v2283_v58 = vld [vmem:[#allocation7 + $0x204] ss:$8 sps:$4 sm:$0xff]  }
  0x67   :  { %564 = vmatpush1.bf16.msra.mxu0 %v2169_v49  ;;  %951 = vmatprep.subr.bf16.mxu1 %v2205_v7  ;;  %v2266_v49 = vld [vmem:[#allocation7 + $0x1d0] ss:$8 sps:$4 sm:$0xff]  }
  0x68   :  { %565 = vmatprep.subr.bf16.mxu0 %v2175_v51  ;;  %v2269_v51 = vld [vmem:[#allocation7 + $0xe0] ss:$8 sps:$4 sm:$0xff]  }
  0x6a   :  { %251 = vmatmul.mubr.bf16.gmra.mrb[8].mxu0 %v2172_v55  ;;  %438 = vmatmul.mubr.bf16.gmra.mrb[8].mxu1 %v2172_v55 }
  0x6b   :  { %566 = vmatpush1.bf16.msra.mxu0 %v2173_v56  ;;  %589 = vmatprep.mubr.bf16.mxu0 %v2446_v0  ;;  %v2280_v56 = vld [vmem:[#allocation7 + $0x1f4] ss:$8 sps:$4 sm:$0xff]  }
  0x6c   :  { %567 = vmatprep.subr.bf16.mxu0 %v2178_v57  ;;  %952 = vmatpush1.bf16.msra.mxu1 %v2203_v8  ;;  %v2278_v57 = vld [vmem:[#allocation7 + $0x1f0] ss:$8 sps:$4 sm:$0xff]  }
  0x6d   :  { %953 = vmatprep.subr.bf16.mxu1 %v2211_v11 }
  0x6f   :  { %568 = vmatpush1.bf16.msra.mxu0 %v2176_v59  ;;  %v273_v59 = vlaneseq }
  0x70   :  { %569 = vmatprep.subr.bf16.mxu0 %v2181_v60  ;;  %954 = vmatpush1.bf16.msra.mxu1 %v2209_v12 }
  0x71   :  { %v2584_v60 = vshrl.u32 %v273_v59, 7 }
  0x73   :  { %570 = vmatpush1.bf16.msra.mxu0 %v2179_v61  ;;  %vm275_vm0 = vcmp.lt.s32.totalorder %v2584_v60, 1  ;;  %v661_v59 = vsub.s32 0, %v2584_v60  ;;  %vm632_vm1 = vcmp.lt.s32.totalorder %v2584_v60, 7 }
  0x74   :  { %571 = vmatprep.subr.bf16.mxu0 %v2184_v62 }
  0x77   :  { %572 = vmatpush1.bf16.msra.mxu0 %v2182_v63 }
  0x78   :  { %1225 = vmatprep.subr.bf16.mxu0 %v2190_v1 }
  0x7a   :  { %590 = vmatmul.mubr.bf16.vlgmr.msra.gmra.mrb[12].mxu0 %v2543_v34  ;;  %v2247_v34 = vld [vmem:[#allocation7 + $0xa4] ss:$8 sps:$4 sm:$0xff]  }
  0x7b   :  { %599 = vmatprep.mubr.bf16.mxu0 %v2446_v0  ;;  %1226 = vmatpush1.bf16.msra.mxu0 %v2188_v2 }
  0x7c   :  { %1227 = vmatprep.subr.bf16.mxu0 %v2196_v3 }
  0x7f   :  { %1228 = vmatpush1.bf16.msra.mxu0 %v2194_v4 }
  0x80   :  { %1229 = vmatprep.subr.bf16.mxu0 %v2202_v5 }
  0x82   :  { %600 = vmatmul.mubr.bf16.gmra.mrb[16].mxu0 %v2554_v39  ;;  %v2251_v39 = vld [vmem:[#allocation7 + $0xb0] ss:$8 sps:$4 sm:$0xff]  }
  0x83   :  { %609 = vmatprep.mubr.bf16.mxu0 %v2446_v0  ;;  %1230 = vmatpush1.bf16.msra.mxu0 %v2200_v6  ;;  %v2217_v0 = vld [vmem:[#allocation7 + $0x54] ss:$8 sps:$4 sm:$0xff]  }
  0x84   :  { %1231 = vmatprep.subr.bf16.mxu0 %v2208_v9  ;;  %955 = vmatprep.subr.bf16.mxu1 %v2217_v0 }
  0x85   :  { %956 = vmatpush1.bf16.msra.mxu1 %v2215_v15 }
  0x86   :  { %957 = vmatprep.subr.bf16.mxu1 %v2223_v19 }
  0x87   :  { %1232 = vmatpush1.bf16.msra.mxu0 %v2206_v10 }
  0x88   :  { %1233 = vmatprep.subr.bf16.mxu0 %v2214_v13 }
  0x89   :  { %958 = vmatpush1.bf16.msra.mxu1 %v2221_v18 }
  0x8a   :  { %610 = vmatmul.mubr.bf16.gmra.mrb[20].mxu0 %v2172_v55  ;;  %959 = vmatprep.subr.bf16.mxu1 %v2229_v22  ;;  %v2275_v55 = vld [vmem:[#allocation7 + $0xf0] ss:$8 sps:$4 sm:$0xff]  }
  0x8b   :  { %1234 = vmatpush1.bf16.msra.mxu0 %v2212_v14 }
  0x8c   :  { %1235 = vmatprep.subr.bf16.mxu0 %v2220_v16 }
  0x8d   :  { %960 = vmatpush1.bf16.msra.mxu1 %v2227_v23 }
  0x8e   :  { %961 = vmatprep.subr.bf16.mxu1 %v2235_v26 }
  0x8f   :  { %1236 = vmatpush1.bf16.msra.mxu0 %v2218_v17 }
  0x90   :  { %1237 = vmatprep.subr.bf16.mxu0 %v2226_v20 }
  0x91   :  { %962 = vmatpush1.bf16.msra.mxu1 %v2233_v27 }
  0x92   :  { %963 = vmatprep.subr.bf16.mxu1 %v2241_v30 }
  0x93   :  { %1238 = vmatpush1.bf16.msra.mxu0 %v2224_v21 }
  0x94   :  { %1239 = vmatprep.subr.bf16.mxu0 %v2232_v24 }
  0x95   :  { %964 = vmatpush1.bf16.msra.mxu1 %v2239_v31 }
  0x96   :  { %965 = vmatprep.subr.bf16.mxu1 %v2247_v34 }
  0x97   :  { %1240 = vmatpush1.bf16.msra.mxu0 %v2230_v25 }
  0x98   :  { %1241 = vmatprep.subr.bf16.mxu0 %v2238_v28 }
  0x99   :  { %966 = vmatpush1.bf16.msra.mxu1 %v2245_v35 }
  0x9a   :  { %967 = vmatprep.subr.bf16.mxu1 %v2253_v38 }
  0x9b   :  { %1242 = vmatpush1.bf16.msra.mxu0 %v2236_v29 }
  0x9c   :  { %1243 = vmatprep.subr.bf16.mxu0 %v2244_v32 }
  0x9d   :  { %968 = vmatpush1.bf16.msra.mxu1 %v2251_v39 }
  0x9e   :  { %969 = vmatprep.subr.bf16.mxu1 %v2259_v42 }
  0x9f   :  { %1244 = vmatpush1.bf16.msra.mxu0 %v2242_v33 }
  0xa0   :  { %1245 = vmatprep.subr.bf16.mxu0 %v2250_v36 }
  0xa1   :  { %970 = vmatpush1.bf16.msra.mxu1 %v2257_v43 }
  0xa2   :  { %971 = vmatprep.subr.bf16.mxu1 %v2265_v46 }
  0xa3   :  { %1246 = vmatpush1.bf16.msra.mxu0 %v2248_v37 }
  0xa4   :  { %1247 = vmatprep.subr.bf16.mxu0 %v2256_v40 }
  0xa5   :  { %972 = vmatpush1.bf16.msra.mxu1 %v2263_v47 }
  0xa6   :  { %973 = vmatprep.subr.bf16.mxu1 %v2271_v50 }
  0xa7   :  { %1248 = vmatpush1.bf16.msra.mxu0 %v2254_v41 }
  0xa8   :  { %1249 = vmatprep.subr.bf16.mxu0 %v2262_v44 }
  0xa9   :  { %974 = vmatpush1.bf16.msra.mxu1 %v2269_v51 }
  0xaa   :  { %975 = vmatprep.subr.bf16.mxu1 %v2277_v54 }
  0xab   :  { %1250 = vmatpush1.bf16.msra.mxu0 %v2260_v45 }
  0xac   :  { %1251 = vmatprep.subr.bf16.mxu0 %v2268_v48 }
  0xad   :  { %976 = vmatpush1.bf16.msra.mxu1 %v2275_v55 }
  0xae   :  { %1493 = vmatprep.subr.bf16.mxu1 %v2283_v58 }
  0xaf   :  { %1252 = vmatpush1.bf16.msra.mxu0 %v2266_v49 }
  0xb0   :  { %1253 = vmatprep.subr.bf16.mxu0 %v2274_v52 }
  0xb3   :  { %1254 = vmatpush1.bf16.msra.mxu0 %v2272_v53 }
  0xb4   :  { %1255 = vmatprep.subr.bf16.mxu0 %v2280_v56 }
  0xb7   :  { %1256 = vmatpush1.bf16.msra.mxu0 %v2278_v57 }
 0x12d   :  { %v232_v61 = vpop.f32.mrb[0].mxu0  ;;  %v419_v2 = vpop.f32.mrb[0].mxu1 }
 0x12e   :  { %v261_v62 = vrot.slane %v232_v61, 7  ;;  %v234_v63 = vpop.f32.mrb[1].mxu0  ;;  %v421_v5 = vpop.f32.mrb[1].mxu1 }
 0x12f   :  { %v236_v1 = vpop.f32.mrb[2].mxu0  ;;  %v262_v6 = vrot.slane %v234_v63, 7  ;;  %v423_v8 = vpop.f32.mrb[2].mxu1  ;;  %v665_v63 = vsub.s32 1, %v2584_v60 }
 0x130   :  { %v263_v3 = vrot.slane %v236_v1, 7  ;;  %v238_v4 = vpop.f32.mrb[3].mxu0  ;;  %v425_v10 = vpop.f32.mrb[3].mxu1 }
 0x131   :  { %v264_v7 = vrot.slane %v238_v4, 7 }
 0x132   :  { %v284_v9 = vsel %vm275_vm0, %v261_v62, %v263_v3 }
 0x133   :  { %v2589_v11 = vadd.f32 %v423_v8, %v284_v9  ;;  %v285_v12 = vsel %vm275_vm0, %v262_v6, %v264_v7 }
 0x134   :  { %v2593_v13 = vadd.f32 %v425_v10, %v285_v12 }
 0x135   :  { %v242_v14 = vpop.f32.mrb[4].mxu0  ;;  %v429_v17 = vpop.f32.mrb[4].mxu1 }
 0x136   :  { %v265_v0 = vrot.slane %v242_v14, 7  ;;  %v244_v15 = vpop.f32.mrb[5].mxu0  ;;  %v431_v20 = vpop.f32.mrb[5].mxu1 }
 0x137   :  { %v266_v16 = vrot.slane %v244_v15, 7  ;;  %v246_v18 = vpop.f32.mrb[6].mxu0  ;;  %v433_v26 = vpop.f32.mrb[6].mxu1 }
 0x138   :  { %v282_v19 = vsel %vm275_vm0, %v263_v3, %v265_v0  ;;  %v267_v21 = vrot.slane %v246_v18, 7  ;;  %v248_v22 = vpop.f32.mrb[7].mxu0  ;;  %v435_v29 = vpop.f32.mrb[7].mxu1 }
 0x139   :  { %v2597_v23 = vadd.f32 %v429_v17, %v282_v19  ;;  %v283_v24 = vsel %vm275_vm0, %v264_v7, %v266_v16  ;;  %v268_v25 = vrot.slane %v248_v22, 7 }
 0x13a   :  { %v2601_v27 = vadd.f32 %v431_v20, %v283_v24  ;;  %v280_v28 = vsel %vm275_vm0, %v265_v0, %v267_v21  ;;  %v2659_v20 = vpop.permute.xlu0 %695 }
 0x13b   :  { %v2605_v30 = vadd.f32 %v433_v26, %v280_v28  ;;  %v281_v31 = vsel %vm275_vm0, %v266_v16, %v268_v25 }
 0x13c   :  { %v2609_v32 = vadd.f32 %v435_v29, %v281_v31 }
 0x13d   :  { %v252_v33 = vpop.f32.mrb[8].mxu0  ;;  %v439_v38 = vpop.f32.mrb[8].mxu1 }
 0x13e   :  { %v269_v34 = vrot.slane %v252_v33, 7  ;;  %v254_v35 = vpop.f32.mrb[9].mxu0  ;;  %v441_v42 = vpop.f32.mrb[9].mxu1 }
 0x13f   :  { %v270_v36 = vrot.slane %v254_v35, 7  ;;  %v256_v37 = vpop.f32.mrb[10].mxu0  ;;  %v443_v46 = vpop.f32.mrb[10].mxu1 }
 0x140   :  { %v271_v39 = vrot.slane %v256_v37, 7  ;;  %v258_v40 = vpop.f32.mrb[11].mxu0  ;;  %v278_v41 = vsel %vm275_vm0, %v267_v21, %v269_v34  ;;  %v445_v50 = vpop.f32.mrb[11].mxu1 }
 0x141   :  { %v272_v43 = vrot.slane %v258_v40, 7  ;;  %v2613_v44 = vadd.f32 %v439_v38, %v278_v41  ;;  %v279_v45 = vsel %vm275_vm0, %v268_v25, %v270_v36  ;;  %v2673_v38 = vpop.permute.xlu1 %705 }
 0x142   :  { %v286_v47 = vsel %vm275_vm0, %v271_v39, %v261_v62  ;;  %v2619_v48 = vadd.f32 %v441_v42, %v279_v45  ;;  %v276_v49 = vsel %vm275_vm0, %v269_v34, %v271_v39  ;;  %v657_v62 = vld [vmem:[%s2891_s3] sm:$0x3] }
 0x143   :  { %v448_v51 = vadd.f32 %v419_v2, %v286_v47  ;;  %v287_v52 = vsel %vm275_vm0, %v272_v43, %v262_v6  ;;  %v2625_v53 = vadd.f32 %v443_v46, %v276_v49  ;;  %v277_v54 = vsel %vm275_vm0, %v270_v36, %v272_v43  ;;  %v2678_v43 = vpop.permute.xlu0 %700 }
 0x144   :  { %v449_v55 = vadd.f32 %v421_v5, %v287_v52  ;;  %v2629_v56 = vadd.f32 %v445_v50, %v277_v54  ;;  %v2647_v7 = vrot.slane %v657_v62, %v661_v59  ;;  %v2655_v10 = vrot.slane %v657_v62, %v665_v63 }
 0x14d   :  { %v2631_v57 = vpop.f32.mrb[12].mxu0 }
 0x14e   :  { %v2633_v58 = vpop.f32.mrb[13].mxu0  ;;  %v620_v1 = vrot.slane %v2631_v57, 1 }
 0x14f   :  { %v595_v61 = vpop.f32.mrb[14].mxu0  ;;  %v621_v4 = vrot.slane %v2633_v58, 1 }
 0x150   :  { %v622_v2 = vrot.slane %v595_v61, 1  ;;  %v597_v3 = vpop.f32.mrb[15].mxu0 }
 0x151   :  { %v623_v5 = vrot.slane %v597_v3, 1 }
 0x152   :  { %v641_v6 = vsel %vm632_vm1, %v620_v1, %v622_v2 }
 0x153   :  { %v645_v8 = vadd.f32 %v641_v6, %v448_v51  ;;  %v642_v9 = vsel %vm632_vm1, %v621_v4, %v623_v5 }
 0x154   :  { %v646_v12 = vadd.f32 %v642_v9, %v449_v55 }
 0x155   :  { %v601_v14 = vpop.f32.mrb[16].mxu0  ;;  %v669_v0 = vadd.f32 %v2647_v7, %v645_v8 }
 0x156   :  { %v624_v15 = vrot.slane %v601_v14, 1  ;;  %v603_v16 = vpop.f32.mrb[17].mxu0  ;;  %v670_v17 = vadd.f32 %v2655_v10, %v646_v12 }
 0x157   :  { %v625_v18 = vrot.slane %v603_v16, 1  ;;  %v605_v19 = vpop.f32.mrb[18].mxu0  ;;  %v681_v29 = vmax.f32 %v669_v0, 0.0 }
 0x158   :  { %v639_v21 = vsel %vm632_vm1, %v622_v2, %v624_v15  ;;  %v626_v22 = vrot.slane %v605_v19, 1  ;;  %v607_v24 = vpop.f32.mrb[19].mxu0  ;;  %v682_v34 = vmax.f32 %v670_v17, 0.0 }
 0x159   :  { %v647_v25 = vadd.f32 %v639_v21, %v2589_v11  ;;  %v640_v26 = vsel %vm632_vm1, %v623_v5, %v625_v18  ;;  %v627_v28 = vrot.slane %v607_v24, 1  ;;  %v2692_v5 = vpop.permute.xlu1 %710 }
 0x15a   :  { %v648_v31 = vadd.f32 %v640_v26, %v2593_v13  ;;  %v637_v33 = vsel %vm632_vm1, %v624_v15, %v626_v22  ;;  %v724_v47 = vmul.f32 %v2659_v20, %v682_v34  ;;  %v2286_v26 = vld [vmem:[#allocation7 + $0x214] ss:$8 sps:$4 sm:$0xff]  }
 0x15b   :  { %v671_v35 = vadd.f32 %v2647_v7, %v647_v25  ;;  %v649_v36 = vadd.f32 %v637_v33, %v2597_v23  ;;  %v638_v37 = vsel %vm632_vm1, %v625_v18, %v627_v28  ;;  %v723_v23 = vmul.f32 %v2659_v20, %v681_v29  ;;  %v2719_v29 = vpop.permute.xlu0 %715 }
 0x15c   :  { %v672_v11 = vadd.f32 %v2655_v10, %v648_v31  ;;  %v650_v39 = vadd.f32 %v638_v37, %v2601_v27 }
 0x15d   :  { %v683_v40 = vmax.f32 %v671_v35, 0.0  ;;  %v611_v41 = vpop.f32.mrb[20].mxu0  ;;  %v673_v13 = vadd.f32 %v2647_v7, %v649_v36  ;;  %v2284_v36 = vld [vmem:[#allocation7 + $0x210] ss:$8 sps:$4 sm:$0xff]  }
 0x15e   :  { %v684_v42 = vmax.f32 %v672_v11, 0.0  ;;  %v628_v45 = vrot.slane %v611_v41, 1  ;;  %v613_v46 = vpop.f32.mrb[21].mxu0  ;;  %v674_v27 = vadd.f32 %v2655_v10, %v650_v39 }
 0x15f   :  { %v725_v49 = vmul.f32 %v2678_v43, %v683_v40  ;;  %v629_v50 = vrot.slane %v613_v46, 1  ;;  %v615_v51 = vpop.f32.mrb[22].mxu0  ;;  %v685_v12 = vmax.f32 %v673_v13, 0.0  ;;  %v2289_v40 = vld [vmem:[#allocation7 + $0x224] ss:$8 sps:$4 sm:$0xff]  }
 0x160   :  { %v726_v52 = vmul.f32 %v2678_v43, %v684_v42  ;;  %v635_v54 = vsel %vm632_vm1, %v626_v22, %v628_v45  ;;  %v630_v55 = vrot.slane %v615_v51, 1  ;;  %v617_v57 = vpop.f32.mrb[23].mxu0  ;;  %v2298_v51 = vld [vmem:[#allocation7 + $0x254] ss:$8 sps:$4 sm:$0xff]  }
 0x161   :  { %v2687_v61 = vpack.c.bf16 %v725_v49, %v723_v23  ;;  %v651_v62 = vadd.f32 %v635_v54, %v2605_v30  ;;  %v636_v2 = vsel %vm632_vm1, %v627_v28, %v629_v50  ;;  %v631_v3 = vrot.slane %v617_v57, 1  ;;  %v2717_v28 = vpop.permute.xlu1 %720  ;;  %v2292_v23 = vld [vmem:[#allocation7 + $0x234] ss:$8 sps:$4 sm:$0xff]   ;;  %v2295_v49 = vld [vmem:[#allocation7 + $0x244] ss:$8 sps:$4 sm:$0xff]  }
 0x162   :  { %v652_v6 = vadd.f32 %v636_v2, %v2609_v32  ;;  %v633_v8 = vsel %vm632_vm1, %v628_v45, %v630_v55  ;;  %v643_v9 = vsel %vm632_vm1, %v630_v55, %v620_v1  ;;  %v686_v1 = vmax.f32 %v674_v27, 0.0  ;;  %v2287_v45 = vld [vmem:[#allocation7 + $0x220] ss:$8 sps:$4 sm:$0xff]   ;;  %v2301_v27 = vld [vmem:[#allocation7 + $0x264] ss:$8 sps:$4 sm:$0xff]  }
 0x163   :  { %v675_v14 = vadd.f32 %v2647_v7, %v651_v62  ;;  %v653_v0 = vadd.f32 %v633_v8, %v2613_v44  ;;  %v655_v30 = vadd.f32 %v643_v9, %v2625_v53  ;;  %v634_v15 = vsel %vm632_vm1, %v629_v50, %v631_v3  ;;  %v2281_v44 = vld [vmem:[#allocation7 + $0x200] ss:$8 sps:$4 sm:$0xff]   ;;  %v2304_v55 = vld [vmem:[#allocation7 + $0x274] ss:$8 sps:$4 sm:$0xff]   ;;  %v2302_v57 = vld [vmem:[#allocation7 + $0x270] ss:$8 sps:$4 sm:$0xff]  }
 0x164   :  { %v676_v16 = vadd.f32 %v2655_v10, %v652_v6  ;;  %v644_v32 = vsel %vm632_vm1, %v631_v3, %v621_v4  ;;  %v654_v17 = vadd.f32 %v634_v15, %v2619_v48  ;;  %v736_v53 = vpack.c.bf16 %v726_v52, %v724_v47  ;;  %v2290_v47 = vld [vmem:[#allocation7 + $0x230] ss:$8 sps:$4 sm:$0xff]   ;;  %v2293_v50 = vld [vmem:[#allocation7 + $0x240] ss:$8 sps:$4 sm:$0xff]   ;;  %v2307_v62 = vld [vmem:[#allocation7 + $0x284] ss:$8 sps:$4 sm:$0xff]  }
 0x165   :  { %v677_v18 = vadd.f32 %v2647_v7, %v653_v0  ;;  %v656_v19 = vadd.f32 %v644_v32, %v2629_v56  ;;  %v687_v21 = vmax.f32 %v675_v14, 0.0  ;;  %v679_v25 = vadd.f32 %v2647_v7, %v655_v30  ;;  %v2296_v52 = vld [vmem:[#allocation7 + $0x250] ss:$8 sps:$4 sm:$0xff]   ;;  %v2299_v54 = vld [vmem:[#allocation7 + $0x260] ss:$8 sps:$4 sm:$0xff]  }
 0x166   :  { %v678_v22 = vadd.f32 %v2655_v10, %v654_v17  ;;  %v688_v24 = vmax.f32 %v676_v16, 0.0  ;;  %v727_v58 = vmul.f32 %v2673_v38, %v685_v12  ;;  %977 = vmatprep.mubr.bf16.mxu1 %v736_v53  ;;  %1257 = vmatprep.mubr.bf16.mxu0 %v736_v53  ;;  %v728_v31 = vmul.f32 %v2673_v38, %v686_v1  ;;  %v2305_v2 = vld [vmem:[#allocation7 + $0x280] ss:$8 sps:$4 sm:$0xff]   ;;  %v2310_v3 = vld [vmem:[#allocation7 + $0x294] ss:$8 sps:$4 sm:$0xff]  }
 0x167   :  { %v729_v4 = vmul.f32 %v2692_v5, %v687_v21  ;;  %v680_v48 = vadd.f32 %v2655_v10, %v656_v19  ;;  %v689_v56 = vmax.f32 %v677_v18, 0.0  ;;  %978 = vmatmul.mubr.bf16.vlgmr.msra.gmra.mrb[12].mxu1 %v2687_v61  ;;  %1258 = vmatmul.mubr.bf16.vlgmr.msra.gmra.mrb[24].mxu0 %v2687_v61  ;;  %v691_v7 = vmax.f32 %v679_v25, 0.0  ;;  %v2308_v6 = vld [vmem:[#allocation7 + $0x290] ss:$8 sps:$4 sm:$0xff]   ;;  %v2313_v8 = vld [vmem:[#allocation7 + $0x2a4] ss:$8 sps:$4 sm:$0xff]  }
 0x168   :  { %v730_v33 = vmul.f32 %v2692_v5, %v688_v24  ;;  %v690_v34 = vmax.f32 %v678_v22, 0.0  ;;  %1494 = vmatpush1.bf16.msra.mxu1 %v2281_v44  ;;  %v2311_v9 = vld [vmem:[#allocation7 + $0x2a0] ss:$8 sps:$4 sm:$0xff]   ;;  %v2316_v12 = vld [vmem:[#allocation7 + $0x2b4] ss:$8 sps:$4 sm:$0xff]  }
 0x169   :  { %v692_v35 = vmax.f32 %v680_v48, 0.0  ;;  %v2725_v37 = vpack.c.bf16 %v729_v4, %v727_v58  ;;  %v731_v10 = vmul.f32 %v2719_v29, %v689_v56  ;;  %v733_v11 = vmul.f32 %v2717_v28, %v691_v7  ;;  %1495 = vmatprep.subr.bf16.mxu1 %v2286_v26  ;;  %v2314_v14 = vld [vmem:[#allocation7 + $0x2b0] ss:$8 sps:$4 sm:$0xff]   ;;  %v2319_v0 = vld [vmem:[#allocation7 + $0x2c4] ss:$8 sps:$4 sm:$0xff]  }
 0x16a   :  { %v2729_v39 = vpack.c.bf16 %v730_v33, %v728_v31  ;;  %v732_v41 = vmul.f32 %v2719_v29, %v690_v34  ;;  %v2317_v30 = vld [vmem:[#allocation7 + $0x2c0] ss:$8 sps:$4 sm:$0xff]   ;;  %v2322_v15 = vld [vmem:[#allocation7 + $0x2d4] ss:$8 sps:$4 sm:$0xff]   ;;  %v2320_v16 = vld [vmem:[#allocation7 + $0x2d0] ss:$8 sps:$4 sm:$0xff]  }
 0x16b   :  { %v734_v13 = vmul.f32 %v2717_v28, %v692_v35  ;;  %v2735_v42 = vpack.c.bf16 %v733_v11, %v731_v10  ;;  %v2325_v32 = vld [vmem:[#allocation7 + $0x2e4] ss:$8 sps:$4 sm:$0xff]   ;;  %v2323_v17 = vld [vmem:[#allocation7 + $0x2e0] ss:$8 sps:$4 sm:$0xff]   ;;  %v2328_v1 = vld [vmem:[#allocation7 + $0x2f4] ss:$8 sps:$4 sm:$0xff]  }
 0x16c   :  { %987 = vmatprep.mubr.bf16.mxu1 %v2729_v39  ;;  %1267 = vmatprep.mubr.bf16.mxu0 %v2729_v39  ;;  %v2326_v18 = vld [vmem:[#allocation7 + $0x2f0] ss:$8 sps:$4 sm:$0xff]   ;;  %v2329_v19 = vld [vmem:[#allocation9 + $0x40] sm:$0xff]   ;;  %v2331_v21 = vld [vmem:[#allocation9 + $0x48] sm:$0xff]  }
 0x16d   :  { %1496 = vmatpush1.bf16.msra.mxu1 %v2284_v36  ;;  %v2737_v46 = vpack.c.bf16 %v734_v13, %v732_v41  ;;  %v2330_v44 = vld [vmem:[#allocation9] sm:$0xff]   ;;  %2077 = vmatprep.subr.bf16.mxu0 %v2329_v19  ;;  %v2333_v22 = vld [vmem:[#allocation9 + $0x50] sm:$0xff]   ;;  %v2336_v25 = vld [vmem:[#allocation9 + $0x18] sm:$0xff]  }
 0x16e   :  { %1497 = vmatprep.subr.bf16.mxu1 %v2289_v40  ;;  %2078 = vmatpush3.bf16.msra.mxu0 %v2330_v44  ;;  %v2334_v24 = vld [vmem:[#allocation9 + $0x10] sm:$0xff]   ;;  %v2337_v26 = vld [vmem:[#allocation9 + $0x60] sm:$0xff]   ;;  %v2339_v4 = vld [vmem:[#allocation9 + $0x68] sm:$0xff]  }
 0x16f   :  { %988 = vmatmul.mubr.bf16.gmra.mrb[16].mxu1 %v2725_v37  ;;  %1268 = vmatmul.mubr.bf16.gmra.mrb[28].mxu0 %v2725_v37  ;;  %v2338_v58 = vld [vmem:[#allocation9 + $0x20] sm:$0xff]   ;;  %v2340_v48 = vld [vmem:[#allocation9 + $0x28] sm:$0xff]   ;;  %v2341_v56 = vld [vmem:[#allocation9 + $0x70] sm:$0xff]  }
 0x170   :  { %997 = vmatprep.mubr.bf16.mxu1 %v2737_v46  ;;  %1277 = vmatprep.mubr.bf16.mxu0 %v2737_v46  ;;  %v2342_v31 = vld [vmem:[#allocation9 + $0x30] sm:$0xff]   ;;  %v2343_v33 = vld [vmem:[#allocation9 + $0x78] sm:$0xff]  }
 0x171   :  { %1498 = vmatpush1.bf16.msra.mxu1 %v2287_v45  ;;  %2079 = vmatprep.subr.bf16.mxu0 %v2331_v21  ;;  %v2344_v7 = vld [vmem:[#allocation9 + $0x38] sm:$0xff]  }
 0x172   :  { %1499 = vmatprep.subr.bf16.mxu1 %v2292_v23 }
 0x175   :  { %1500 = vmatpush1.bf16.msra.mxu1 %v2290_v47 }
 0x176   :  { %1501 = vmatprep.subr.bf16.mxu1 %v2295_v49 }
 0x177   :  { %998 = vmatmul.mubr.bf16.gmra.mrb[20].mxu1 %v2735_v42  ;;  %1278 = vmatmul.mubr.bf16.gmra.mrb[32].mxu0 %v2735_v42 }
 0x178   :  { %1525 = vmatprep.mubr.bf16.mxu1 %v736_v53  ;;  %v2332_v53 = vld [vmem:[#allocation9 + $0x8] sm:$0xff]  }
 0x179   :  { %1502 = vmatpush1.bf16.msra.mxu1 %v2293_v50  ;;  %2080 = vmatpush3.bf16.msra.mxu0 %v2332_v53 }
 0x17a   :  { %1503 = vmatprep.subr.bf16.mxu1 %v2298_v51  ;;  %2081 = vmatprep.subr.bf16.mxu0 %v2333_v22 }
 0x17d   :  { %1504 = vmatpush1.bf16.msra.mxu1 %v2296_v52  ;;  %2082 = vmatpush3.bf16.msra.mxu0 %v2334_v24 }
 0x17e   :  { %1505 = vmatprep.subr.bf16.mxu1 %v2301_v27 }
 0x181   :  { %1506 = vmatpush1.bf16.msra.mxu1 %v2299_v54 }
 0x182   :  { %1507 = vmatprep.subr.bf16.mxu1 %v2304_v55 }
 0x185   :  { %1508 = vmatpush1.bf16.msra.mxu1 %v2302_v57 }
 0x186   :  { %1509 = vmatprep.subr.bf16.mxu1 %v2307_v62 }
 0x189   :  { %1510 = vmatpush1.bf16.msra.mxu1 %v2305_v2 }
 0x18a   :  { %1511 = vmatprep.subr.bf16.mxu1 %v2310_v3 }
 0x18d   :  { %1512 = vmatpush1.bf16.msra.mxu1 %v2308_v6 }
 0x18e   :  { %1513 = vmatprep.subr.bf16.mxu1 %v2313_v8 }
 0x191   :  { %1514 = vmatpush1.bf16.msra.mxu1 %v2311_v9 }
 0x192   :  { %1515 = vmatprep.subr.bf16.mxu1 %v2316_v12 }
 0x195   :  { %1516 = vmatpush1.bf16.msra.mxu1 %v2314_v14 }
 0x196   :  { %1517 = vmatprep.subr.bf16.mxu1 %v2319_v0 }
 0x199   :  { %1518 = vmatpush1.bf16.msra.mxu1 %v2317_v30 }
 0x19a   :  { %1519 = vmatprep.subr.bf16.mxu1 %v2322_v15 }
 0x19d   :  { %1520 = vmatpush1.bf16.msra.mxu1 %v2320_v16 }
 0x19e   :  { %1521 = vmatprep.subr.bf16.mxu1 %v2325_v32 }
 0x1a1   :  { %1522 = vmatpush1.bf16.msra.mxu1 %v2323_v17 }
 0x1a2   :  { %1523 = vmatprep.subr.bf16.mxu1 %v2328_v1 }
 0x1a5   :  { %1524 = vmatpush1.bf16.msra.mxu1 %v2326_v18 }
 0x1a8   :  { %1526 = vmatmul.mubr.bf16.vlgmr.msra.gmra.mrb[24].mxu1 %v2687_v61  ;;  %v2335_v61 = vld [vmem:[#allocation9 + $0x58] sm:$0xff]  }
 0x1a9   :  { %1535 = vmatprep.mubr.bf16.mxu1 %v2729_v39  ;;  %2083 = vmatprep.subr.bf16.mxu0 %v2335_v61 }
 0x1aa   :  { %2084 = vmatpush3.bf16.msra.mxu0 %v2336_v25 }
 0x1ab   :  { %2085 = vmatprep.subr.bf16.mxu0 %v2337_v26 }
 0x1ae   :  { %2086 = vmatpush3.bf16.msra.mxu0 %v2338_v58 }
 0x1af   :  { %2087 = vmatprep.subr.bf16.mxu0 %v2339_v4 }
 0x1b0   :  { %1536 = vmatmul.mubr.bf16.gmra.mrb[28].mxu1 %v2725_v37 }
 0x1b1   :  { %1545 = vmatprep.mubr.bf16.mxu1 %v2737_v46 }
 0x1b2   :  { %2088 = vmatpush3.bf16.msra.mxu0 %v2340_v48 }
 0x1b3   :  { %2089 = vmatprep.subr.bf16.mxu0 %v2341_v56 }
 0x1b6   :  { %2090 = vmatpush3.bf16.msra.mxu0 %v2342_v31 }
 0x1b7   :  { %2091 = vmatprep.subr.bf16.mxu0 %v2343_v33 }
 0x1b8   :  { %1546 = vmatmul.mubr.bf16.gmra.mrb[32].mxu1 %v2735_v42 }
 0x1ba   :  { %2092 = vmatpush3.bf16.msra.mxu0 %v2344_v7 }
 0x23a   :  { %v979_v34 = vpop.f32.mrb[12].mxu1  ;;  %v1259_v35 = vpop.f32.mrb[24].mxu0 }
 0x23b   :  { %v981_v36 = vpop.f32.mrb[13].mxu1  ;;  %v1261_v37 = vpop.f32.mrb[25].mxu0  ;;  %v1008_v39 = vrot.slane %v979_v34, 7 }
 0x23c   :  { %v983_v10 = vpop.f32.mrb[14].mxu1  ;;  %v1263_v11 = vpop.f32.mrb[26].mxu0  ;;  %v1009_v42 = vrot.slane %v981_v36, 7 }
 0x23d   :  { %v1010_v40 = vrot.slane %v983_v10, 7  ;;  %v985_v41 = vpop.f32.mrb[15].mxu1  ;;  %v1265_v13 = vpop.f32.mrb[27].mxu0 }
 0x23e   :  { %v1011_v45 = vrot.slane %v985_v41, 7 }
 0x23f   :  { %v1028_v46 = vsel %vm275_vm0, %v1008_v39, %v1010_v40 }
 0x240   :  { %v2752_v23 = vadd.f32 %v1263_v11, %v1028_v46  ;;  %v1029_v47 = vsel %vm275_vm0, %v1009_v42, %v1011_v45 }
 0x241   :  { %v2756_v49 = vadd.f32 %v1265_v13, %v1029_v47 }
 0x242   :  { %v989_v50 = vpop.f32.mrb[16].mxu1  ;;  %v1269_v51 = vpop.f32.mrb[28].mxu0 }
 0x243   :  { %v1012_v52 = vrot.slane %v989_v50, 7  ;;  %v991_v27 = vpop.f32.mrb[17].mxu1  ;;  %v1271_v54 = vpop.f32.mrb[29].mxu0 }
 0x244   :  { %v1013_v55 = vrot.slane %v991_v27, 7  ;;  %v993_v57 = vpop.f32.mrb[18].mxu1  ;;  %v1273_v62 = vpop.f32.mrb[30].mxu0 }
 0x245   :  { %v1026_v2 = vsel %vm275_vm0, %v1010_v40, %v1012_v52  ;;  %v1014_v3 = vrot.slane %v993_v57, 7  ;;  %v995_v6 = vpop.f32.mrb[19].mxu1  ;;  %v1275_v8 = vpop.f32.mrb[31].mxu0 }
 0x246   :  { %v2760_v9 = vadd.f32 %v1269_v51, %v1026_v2  ;;  %v1027_v12 = vsel %vm275_vm0, %v1011_v45, %v1013_v55  ;;  %v1015_v14 = vrot.slane %v995_v6, 7 }
 0x247   :  { %v2764_v0 = vadd.f32 %v1271_v54, %v1027_v12  ;;  %v1024_v30 = vsel %vm275_vm0, %v1012_v52, %v1014_v3 }
 0x248   :  { %v2768_v15 = vadd.f32 %v1273_v62, %v1024_v30  ;;  %v1025_v16 = vsel %vm275_vm0, %v1013_v55, %v1015_v14 }
 0x249   :  { %v2772_v32 = vadd.f32 %v1275_v8, %v1025_v16 }
 0x24a   :  { %v999_v17 = vpop.f32.mrb[20].mxu1  ;;  %v1279_v1 = vpop.f32.mrb[32].mxu0 }
 0x24b   :  { %v1016_v18 = vrot.slane %v999_v17, 7  ;;  %v1001_v19 = vpop.f32.mrb[21].mxu1  ;;  %v1281_v44 = vpop.f32.mrb[33].mxu0 }
 0x24c   :  { %v1017_v21 = vrot.slane %v1001_v19, 7  ;;  %v1003_v53 = vpop.f32.mrb[22].mxu1  ;;  %v1283_v22 = vpop.f32.mrb[34].mxu0 }
 0x24d   :  { %v1022_v24 = vsel %vm275_vm0, %v1014_v3, %v1016_v18  ;;  %v1018_v61 = vrot.slane %v1003_v53, 7  ;;  %v1005_v25 = vpop.f32.mrb[23].mxu1  ;;  %v1285_v26 = vpop.f32.mrb[35].mxu0 }
 0x24e   :  { %v2776_v58 = vadd.f32 %v1279_v1, %v1022_v24  ;;  %v1023_v4 = vsel %vm275_vm0, %v1015_v14, %v1017_v21  ;;  %v1019_v48 = vrot.slane %v1005_v25, 7 }
 0x24f   :  { %v2780_v56 = vadd.f32 %v1281_v44, %v1023_v4  ;;  %v1030_v31 = vsel %vm275_vm0, %v1018_v61, %v1008_v39  ;;  %v1020_v33 = vsel %vm275_vm0, %v1016_v18, %v1018_v61 }
 0x250   :  { %v1288_v7 = vadd.f32 %v1259_v35, %v1030_v31  ;;  %v2786_v34 = vadd.f32 %v1283_v22, %v1020_v33  ;;  %v1031_v36 = vsel %vm275_vm0, %v1019_v48, %v1009_v42  ;;  %v1021_v10 = vsel %vm275_vm0, %v1017_v21, %v1019_v48  ;;  %v1592_v35 = vld [vmem:[%s2893_s5] sm:$0x3] }
 0x251   :  { %v1289_v11 = vadd.f32 %v1261_v37, %v1031_v36  ;;  %v2792_v40 = vadd.f32 %v1285_v26, %v1021_v10  ;;  %v2807_v51 = vrot.slane %v1592_v35, %v661_v59  ;;  %v2815_v54 = vrot.slane %v1592_v35, %v665_v63 }
 0x27b   :  { %v2794_v41 = vpop.f32.mrb[24].mxu1 }
 0x27c   :  { %v2796_v13 = vpop.f32.mrb[25].mxu1  ;;  %v1556_v45 = vrot.slane %v2794_v41, 1 }
 0x27d   :  { %v1531_v39 = vpop.f32.mrb[26].mxu1  ;;  %v1557_v42 = vrot.slane %v2796_v13, 1 }
 0x27e   :  { %v1558_v46 = vrot.slane %v1531_v39, 1  ;;  %v1533_v47 = vpop.f32.mrb[27].mxu1 }
 0x27f   :  { %v1559_v50 = vrot.slane %v1533_v47, 1 }
 0x280   :  { %v1576_v37 = vsel %vm632_vm1, %v1556_v45, %v1558_v46 }
 0x281   :  { %v1580_v52 = vadd.f32 %v1576_v37, %v1288_v7  ;;  %v1577_v27 = vsel %vm632_vm1, %v1557_v42, %v1559_v50 }
 0x282   :  { %v1581_v55 = vadd.f32 %v1577_v27, %v1289_v11 }
 0x283   :  { %v1537_v57 = vpop.f32.mrb[28].mxu1  ;;  %v1604_v62 = vadd.f32 %v2807_v51, %v1580_v52 }
 0x284   :  { %v1560_v2 = vrot.slane %v1537_v57, 1  ;;  %v1539_v3 = vpop.f32.mrb[29].mxu1  ;;  %v1605_v6 = vadd.f32 %v2815_v54, %v1581_v55 }
 0x285   :  { %v1561_v59 = vrot.slane %v1539_v3, 1  ;;  %v1541_v8 = vpop.f32.mrb[30].mxu1  ;;  %v1616_v1 = vmax.f32 %v1604_v62, 0.0 }
 0x286   :  { %v1574_v12 = vsel %vm632_vm1, %v1558_v46, %v1560_v2  ;;  %v1562_v14 = vrot.slane %v1541_v8, 1  ;;  %v1543_v30 = vpop.f32.mrb[31].mxu1  ;;  %v1617_v44 = vmax.f32 %v1605_v6, 0.0 }
 0x287   :  { %v1582_v16 = vadd.f32 %v1574_v12, %v2752_v23  ;;  %v1575_v63 = vsel %vm632_vm1, %v1559_v50, %v1561_v59  ;;  %v1563_v17 = vrot.slane %v1543_v30, 1 }
 0x288   :  { %v1583_v18 = vadd.f32 %v1575_v63, %v2756_v49  ;;  %v1572_v19 = vsel %vm632_vm1, %v1560_v2, %v1562_v14  ;;  %v1628_v49 = vmul.f32 %v1616_v1, %v2659_v20 }
 0x289   :  { %v1606_v21 = vadd.f32 %v2807_v51, %v1582_v16  ;;  %v1584_v53 = vadd.f32 %v1572_v19, %v2760_v9  ;;  %v1573_v22 = vsel %vm632_vm1, %v1561_v59, %v1563_v17  ;;  %v1629_v9 = vmul.f32 %v1617_v44, %v2659_v20 }
 0x28a   :  { %v1607_v23 = vadd.f32 %v2815_v54, %v1583_v18  ;;  %v1585_v24 = vadd.f32 %v1573_v22, %v2764_v0 }
 0x28b   :  { %v1618_v61 = vmax.f32 %v1606_v21, 0.0  ;;  %v1608_v25 = vadd.f32 %v2807_v51, %v1584_v53  ;;  %v1547_v26 = vpop.f32.mrb[32].mxu1 }
 0x28c   :  { %v1619_v4 = vmax.f32 %v1607_v23, 0.0  ;;  %v1609_v48 = vadd.f32 %v2815_v54, %v1585_v24  ;;  %v1564_v31 = vrot.slane %v1547_v26, 1  ;;  %v1549_v33 = vpop.f32.mrb[33].mxu1 }
 0x28d   :  { %v1630_v7 = vmul.f32 %v1618_v61, %v2678_v43  ;;  %v1620_v36 = vmax.f32 %v1608_v25, 0.0  ;;  %v1565_v10 = vrot.slane %v1549_v33, 1  ;;  %v1551_v11 = vpop.f32.mrb[34].mxu1 }
 0x28e   :  { %v1631_v0 = vmul.f32 %v1619_v4, %v2678_v43  ;;  %v1621_v41 = vmax.f32 %v1609_v48, 0.0  ;;  %v1570_v39 = vsel %vm632_vm1, %v1562_v14, %v1564_v31  ;;  %v1566_v35 = vrot.slane %v1551_v11, 1  ;;  %v1553_v46 = vpop.f32.mrb[35].mxu1 }
 0x28f   :  { %v1640_v47 = vpack.c.bf16 %v1630_v7, %v1628_v49  ;;  %v1586_v50 = vadd.f32 %v1570_v39, %v2768_v15  ;;  %v1571_v37 = vsel %vm632_vm1, %v1563_v17, %v1565_v10  ;;  %v1632_v43 = vmul.f32 %v1620_v36, %v2673_v38 }
 0x290   :  { %v1641_v20 = vpack.c.bf16 %v1631_v0, %v1629_v9  ;;  %v1587_v52 = vadd.f32 %v1571_v37, %v2772_v32  ;;  %v1568_v27 = vsel %vm632_vm1, %v1564_v31, %v1566_v35  ;;  %v1578_v57 = vsel %vm632_vm1, %v1566_v35, %v1556_v45 }
 0x291   :  { %v1610_v55 = vadd.f32 %v2807_v51, %v1586_v50  ;;  %v1658_v62 = vunpack.c.l.bf16 %v1640_v47  ;;  %v1633_v2 = vmul.f32 %v1621_v41, %v2673_v38  ;;  %v1588_v3 = vadd.f32 %v1568_v27, %v2776_v58 }
 0x292   :  { %v1611_v15 = vadd.f32 %v2815_v54, %v1587_v52  ;;  %v1660_v6 = vunpack.c.h.bf16 %v1640_v47  ;;  %v1590_v32 = vadd.f32 %v1578_v57, %v2786_v34  ;;  %v1567_v8 = vrot.slane %v1553_v46, 1 }
 0x293   :  { %v1622_v59 = vmax.f32 %v1610_v55, 0.0  ;;  %v1659_v12 = vunpack.c.l.bf16 %v1641_v20  ;;  %v1661_v14 = vunpack.c.h.bf16 %v1641_v20  ;;  %v1612_v16 = vadd.f32 %v2807_v51, %v1588_v3 }
 0x294   :  { %v1623_v30 = vmax.f32 %v1611_v15, 0.0  ;;  %v1614_v45 = vadd.f32 %v2807_v51, %v1590_v32  ;;  %v1569_v38 = vsel %vm632_vm1, %v1565_v10, %v1567_v8  ;;  %v1579_v58 = vsel %vm632_vm1, %v1567_v8, %v1557_v42 }
 0x295   :  { %v1634_v63 = vmul.f32 %v1622_v59, %v2692_v5  ;;  %v1624_v17 = vmax.f32 %v1612_v16, 0.0  ;;  %v1589_v1 = vadd.f32 %v1569_v38, %v2780_v56  ;;  %v1591_v18 = vadd.f32 %v1579_v58, %v2792_v40 }
 0x296   :  { %v1635_v34 = vmul.f32 %v1623_v30, %v2692_v5  ;;  %v1626_v44 = vmax.f32 %v1614_v45, 0.0  ;;  %v1670_v13 = vadd.f32 %v1660_v6, %v1658_v62  ;;  %v1678_v42 = vadd.f32 %v1661_v14, %v1659_v12 }
 0x297   :  { %v1642_v19 = vpack.c.bf16 %v1634_v63, %v1632_v43  ;;  %v1636_v51 = vmul.f32 %v1624_v17, %v2719_v29  ;;  %v1613_v53 = vadd.f32 %v2815_v54, %v1589_v1  ;;  %v1615_v22 = vadd.f32 %v2815_v54, %v1591_v18 }
 0x298   :  { %v1643_v21 = vpack.c.bf16 %v1635_v34, %v1633_v2  ;;  %v1638_v60 = vmul.f32 %v1626_v44, %v2717_v28 }
 0x299   :  { %v1662_v23 = vunpack.c.l.bf16 %v1642_v19  ;;  %v1625_v24 = vmax.f32 %v1613_v53, 0.0  ;;  %v1627_v61 = vmax.f32 %v1615_v22, 0.0  ;;  %v1664_v4 = vunpack.c.h.bf16 %v1642_v19 }
 0x29a   :  { %v1663_v5 = vunpack.c.l.bf16 %v1643_v21  ;;  %v1644_v25 = vpack.c.bf16 %v1638_v60, %v1636_v51  ;;  %v1665_v10 = vunpack.c.h.bf16 %v1643_v21  ;;  %v2060_v21 = vld [vmem:[%s2895_s7] ss:$0 sm:$0xff] }
 0x29b   :  { %v1671_v56 = vadd.f32 %v1670_v13, %v1662_v23  ;;  %v1637_v40 = vmul.f32 %v1625_v24, %v2719_v29  ;;  %v1639_v26 = vmul.f32 %v1627_v61, %v2717_v28 }
 0x29c   :  { %v1679_v49 = vadd.f32 %v1678_v42, %v1663_v5  ;;  %v1666_v31 = vunpack.c.l.bf16 %v1644_v25  ;;  %v1668_v9 = vunpack.c.h.bf16 %v1644_v25 }
 0x29d   :  { %v1672_v48 = vrot.slane %v1671_v56, 4  ;;  %v1645_v33 = vpack.c.bf16 %v1639_v26, %v1637_v40 }
 0x29e   :  { %v1680_v54 = vrot.slane %v1679_v49, 4  ;;  %v1686_v7 = vadd.f32 %v1666_v31, %v1664_v4 }
 0x29f   :  { %v1673_v36 = vadd.f32 %v1672_v48, %v1671_v56  ;;  %v1667_v11 = vunpack.c.l.bf16 %v1645_v33  ;;  %v1669_v35 = vunpack.c.h.bf16 %v1645_v33 }
 0x2a0   :  { %v1681_v0 = vadd.f32 %v1680_v54, %v1679_v49  ;;  %v1687_v41 = vadd.f32 %v1686_v7, %v1668_v9 }
 0x2a1   :  { %v1674_v39 = vrot.slane %v1673_v36, 2  ;;  %v1694_v46 = vadd.f32 %v1667_v11, %v1665_v10 }
 0x2a2   :  { %v1682_v47 = vrot.slane %v1681_v0, 2  ;;  %v1688_v29 = vrot.slane %v1687_v41, 4 }
 0x2a3   :  { %v1675_v50 = vadd.f32 %v1674_v39, %v1673_v36  ;;  %v1695_v37 = vadd.f32 %v1694_v46, %v1669_v35 }
 0x2a4   :  { %v1683_v28 = vadd.f32 %v1682_v47, %v1681_v0  ;;  %v1689_v52 = vadd.f32 %v1688_v29, %v1687_v41 }
 0x2a5   :  { %v1676_v20 = vrot.slane %v1675_v50, 1  ;;  %v1696_v27 = vrot.slane %v1695_v37, 4 }
 0x2a6   :  { %v1690_v43 = vrot.slane %v1689_v52, 2  ;;  %v1684_v55 = vrot.slane %v1683_v28, 1 }
 0x2a7   :  { %v1697_v57 = vadd.f32 %v1696_v27, %v1695_v37  ;;  %v1677_v62 = vadd.f32 %v1676_v20, %v1675_v50 }
 0x2a8   :  { %v1691_v2 = vadd.f32 %v1690_v43, %v1689_v52  ;;  %v1685_v6 = vadd.f32 %v1684_v55, %v1683_v28 }
 0x2a9   :  { %v1698_v15 = vrot.slane %v1697_v57, 2  ;;  %v1702_v8 = vpack.c.bf16 %v1677_v62, %v1677_v62 }
 0x2aa   :  { %v1692_v3 = vrot.slane %v1691_v2, 1  ;;  %v1703_v16 = vpack.c.bf16 %v1685_v6, %v1685_v6 }
 0x2ab   :  { %v1699_v59 = vadd.f32 %v1698_v15, %v1697_v57  ;;  %v1749_v63 = vunpack.c.l.b16 %v1702_v8 }
 0x2ac   :  { %v1693_v32 = vadd.f32 %v1692_v3, %v1691_v2  ;;  %v1750_v34 = vunpack.c.l.b16 %v1703_v16 }
 0x2ad   :  { %v1700_v12 = vrot.slane %v1699_v59, 1 }
 0x2ae   :  { %v1704_v14 = vpack.c.bf16 %v1693_v32, %v1693_v32 }
 0x2af   :  { %v1701_v30 = vadd.f32 %v1700_v12, %v1699_v59 }
 0x2b0   :  { %v1751_v45 = vunpack.c.l.b16 %v1704_v14 }
 0x2b1   :  { %v1705_v38 = vpack.c.bf16 %v1701_v30, %v1701_v30 }
 0x2b2   :  { %v1754_v58 = vsel %vm1753_vm2, %v1751_v45, %v1749_v63 }
 0x2b3   :  { %v1752_v17 = vunpack.c.l.b16 %v1705_v38  ;;  %v1756_v19 = vpack.c.b16 %v1754_v58, %v1754_v58 }
 0x2b5   :  { %v1755_v1 = vsel %vm1753_vm2, %v1752_v17, %v1750_v34 }
 0x2b6   :  { %v1757_v18 = vpack.c.b16 %v1755_v1, %v1755_v1 }
 0x2b8   :  { %1888 = vmatprep.mubr.bf16.mxu0 %v1757_v18 }
 0x2b9   :  { %1889 = vmatmul.mubr.bf16.vlgmr.msra.gmra.mrb[36].mxu0 %v1756_v19 }
 0x38c   :  { %v2093_v44 = vpop.f32.mrb[36].mxu0 }
 0x38d   :  { %v2094_v51 = vpop.f32.mrb[37].mxu0 }
 0x38e   :  { %v2095_v53 = vadd.f32 %v2094_v51, %v2093_v44  ;;  %v2096_v22 = vpop.f32.mrb[38].mxu0 }
 0x38f   :  { %v2097_v13 = vpop.f32.mrb[39].mxu0 }
 0x390   :  { %v1891_v23 = vadd.f32 %v2095_v53, %v2060_v21 }
 0x392   :  { %1896 = vst [vmem:[#allocation10] sm:$0x3] %v1891_v23 }
 0x393   :  { %2422 = shalt.err (!%p2419_p0)
}
 0x394   :  { %s2423_s7 = scalar_lea.hbm %s2896_s8, 32 }
 0x395   :  { %p2424_p1 = scmp.ne.s32.totalorder %s2896_s8, %s2423_s7  ;;  %p2427_p2 = scmp.lt.u32.totalorder %s2423_s7, %s2896_s8 }
 0x397   :  { %p2429_p3 = pnand %p2427_p2, %p2424_p1 }
 0x399   :  { %2432 = shalt.err (!%p2429_p3)
}
 0x39a   :  { %1906 = dma.vmem_to_hbm [thread:$0]  %s1904_s2, 32, %s2896_s8, [#allocation6]  }
 0x39b   :  { %2437 = dma.done.wait [#allocation6], 32  }
 0x39c   :  { %2438 = vsyncadd [#allocation6], 4294967264 }
 0x39d   :  { %1910 = vsyncpa [#allocation5], 1 }
 0x39e   :  { %1911 = vsyncpa [#allocation8], 1 }
 0x39f   :  { %1912 = vsyncpa [#allocation6], 1 }

</bundles_post_ra>
